<compile_context>
chip_gen: v7x
topology: tpu7x:2x2x1
jax: 0.10.0
libtpu: 0.0.40
codegen_flags: <defaults>
</compile_context>

<pallas_src>
import functools

import numpy as np

import jax
import jax.numpy as jnp
from jax.experimental import pallas as pl
from jax.experimental.pallas import tpu as pltpu


# ----------------------------------------------------------------------------
# Pallas kernel: single invocation, whole batch resident in VMEM.
# ----------------------------------------------------------------------------
def _mixed_op_kernel(alpha_ref, convb_ref,                       # SMEM scalars
                     x_ref, w1_ref, b1_ref, w2t_ref, b2_ref,     # VMEM tiles
                     wmask_ref, xmask_ref,
                     o_ref, *, shifts):
    N, C, HW = x_ref.shape

    a_skip = alpha_ref[1]          # alpha[0] weights the 'none' op (zeros) -> drops out
    a_ch = alpha_ref[2]
    a_sp = alpha_ref[3]
    cb = convb_ref[0]

    w1 = w1_ref[...]               # (C, Ch)
    b1 = b1_ref[...]               # (1, Ch)
    w2t = w2t_ref[...]             # (C, Ch)  == w2.T
    b2 = b2_ref[...]               # (C, 1)
    wmask = wmask_ref[...]         # (k*k, HW)  conv weight (mean tap) * validity
    xmask = xmask_ref[...]         # (k*k, HW)  conv weight (max tap)  * validity

    # TODO(synk): for production feature-map sizes switch to grid=(N, H-tiles)
    # with dimension_semantics=("parallel", ...) + halo handling and an explicit
    # vmem_limit_bytes; at this toy size a single gridless step is fastest.
    for n in range(N):                                  # statically unrolled, N tiny
        xn = x_ref[n]                                   # (C, HW) f32, lane-dense

        # ---- channel attention (SE): avg-pool -> MLP -> sigmoid, off the MXU ----
        avg = jnp.mean(xn, axis=1, keepdims=True)                       # (C, 1)
        hid = jnp.maximum(
            jnp.sum(avg * w1, axis=0, keepdims=True) + b1, 0.0)         # (1, Ch)
        ch_att = jax.nn.sigmoid(
            jnp.sum(hid * w2t, axis=1, keepdims=True) + b2)             # (C, 1)

        # ---- spatial attention: kxk conv over [mean_c, max_c] via lane rolls ----
        mean_c = jnp.mean(xn, axis=0, keepdims=True)                    # (1, HW)
        max_c = jnp.max(xn, axis=0, keepdims=True)                      # (1, HW)
        conv = jnp.zeros((1, HW), jnp.float32) + cb
        for t, shift in enumerate(shifts):              # statically unrolled taps
            rm = mean_c if shift == 0 else pltpu.roll(mean_c, shift, 1)
            rx = max_c if shift == 0 else pltpu.roll(max_c, shift, 1)
            conv = conv + rm * wmask[t:t + 1, :] + rx * xmask[t:t + 1, :]
        sp_att = jax.nn.sigmoid(conv)                                   # (1, HW)

        # ---- fused mix: one gate build + one full-tile multiply -----------------
        gate = a_skip + a_ch * ch_att + a_sp * sp_att                   # (C, HW)
        o_ref[n] = xn * gate


# ----------------------------------------------------------------------------
# Per-tap roll shifts + boundary-weighted masks for the flattened "same" conv.
# ----------------------------------------------------------------------------
def _conv_tap_tables(convw, H, W):
    k = convw.shape[0]
    p = k // 2
    HW = H * W
    hh = np.arange(HW, dtype=np.int64) // W
    ww = np.arange(HW, dtype=np.int64) % W
    shifts, wm, wx = [], [], []
    for di in range(k):
        for dj in range(k):
            dh, dw = di - p, dj - p
            # rolled[i] = flat[(i + dh*W + dw) mod HW]; mask kills wrap/OOB taps.
            shifts.append(int((-(dh * W + dw)) % HW))
            valid = ((hh + dh >= 0) & (hh + dh < H) &
                     (ww + dw >= 0) & (ww + dw < W)).astype(np.float32)
            wm.append(convw[di, dj, 0] * valid)
            wx.append(convw[di, dj, 1] * valid)
    wmask = jnp.stack(wm).astype(jnp.float32)           # (k*k, HW)
    xmask = jnp.stack(wx).astype(jnp.float32)           # (k*k, HW)
    return tuple(shifts), wmask, xmask


# ----------------------------------------------------------------------------
# Parameters (deterministic, synthetic)
# ----------------------------------------------------------------------------
def init_params(key, gate_channels, reduction_ratio, kernel_size):
    C = gate_channels
    Ch = max(C // reduction_ratio, 1)
    k = kernel_size
    k0, k1, k2, k3, k4, k5 = jax.random.split(key, 6)
    w1 = jax.random.normal(k0, (C, Ch), jnp.float32) * 0.2    # fc1: C -> C//r
    b1 = jax.random.normal(k1, (1, Ch), jnp.float32) * 0.1
    w2 = jax.random.normal(k2, (Ch, C), jnp.float32) * 0.2    # fc2: C//r -> C
    b2 = jax.random.normal(k3, (1, C), jnp.float32) * 0.1
    convw = jax.random.normal(k4, (k, k, 2), jnp.float32) * 0.2   # 2->1 kxk
    convb = jax.random.normal(k5, (1,), jnp.float32) * 0.1
    return w1, b1, w2, b2, convw, convb


# ----------------------------------------------------------------------------
# Wrapper: NCHW in / NCHW out (matches the PyTorch module), no transposes.
# ----------------------------------------------------------------------------
def search_cell_forward(x_nchw, weights, params, *, kernel_size):
    w1, b1, w2, b2, convw, convb = params
    assert convw.shape[0] == kernel_size and convw.shape[1] == kernel_size
    N, C, H, W = x_nchw.shape
    HW = H * W

    x = x_nchw.reshape(N, C, HW).astype(jnp.float32)     # free contiguous reshape
    w2t = jnp.transpose(w2).astype(jnp.float32)          # (C, Ch), tiny, once
    b2c = b2.reshape(C, 1).astype(jnp.float32)           # (C, 1)
    shifts, wmask, xmask = _conv_tap_tables(convw, H, W)

    kernel = functools.partial(_mixed_op_kernel, shifts=shifts)
    smem = pl.BlockSpec(memory_space=pltpu.MemorySpace.SMEM)
    vmem = pl.BlockSpec(memory_space=pltpu.MemorySpace.VMEM)

    out = pl.pallas_call(
        kernel,
        out_shape=jax.ShapeDtypeStruct((N, C, HW), jnp.float32),
        in_specs=[smem,              # mix weights (num_ops,)
                  smem,              # conv bias (1,)
                  vmem,              # x (N, C, HW)
                  vmem,              # fc1 w (C, Ch)
                  vmem,              # fc1 b (1, Ch)
                  vmem,              # fc2 w^T (C, Ch)
                  vmem,              # fc2 b (C, 1)
                  vmem,              # weighted mean-tap masks (k*k, HW)
                  vmem],             # weighted max-tap masks  (k*k, HW)
        out_specs=vmem,
    )(weights.astype(jnp.float32), convb.astype(jnp.float32),
      x, w1.astype(jnp.float32), b1.astype(jnp.float32), w2t, b2c, wmask, xmask)
    return out.reshape(N, C, H, W)


# ----------------------------------------------------------------------------
# Pure-JAX reference for validation (NCHW, padded-slice conv)
# ----------------------------------------------------------------------------
def reference_forward(x_nchw, alphas, params, *, kernel_size):
    w1, b1, w2, b2, convw, convb = params
    k = kernel_size
    p = k // 2
    x = x_nchw.astype(jnp.float32)
    N, C, H, W = x.shape

    avg = x.mean(axis=(2, 3))                            # (N, C)
    hid = jnp.maximum(avg @ w1 + b1, 0.0)
    ch = jax.nn.sigmoid(hid @ w2 + b2)                   # (N, C)
    x_ch = x * ch[:, :, None, None]

    mean_c = x.mean(axis=1)                              # (N, H, W)
    max_c = x.max(axis=1)
    pad_mean = jnp.pad(mean_c, ((0, 0), (p, p), (p, p)))
    pad_max = jnp.pad(max_c, ((0, 0), (p, p), (p, p)))
    conv = jnp.zeros((N, H, W), jnp.float32)
    for di in range(k):
        for dj in range(k):
            conv = conv + convw[di, dj, 0] * pad_mean[:, di:di + H, dj:dj + W]
            conv = conv + convw[di, dj, 1] * pad_max[:, di:di + H, dj:dj + W]
    sp = jax.nn.sigmoid(conv + convb[0])
    x_sp = x * sp[:, None, :, :]

    return alphas[1] * x + alphas[2] * x_ch + alphas[3] * x_sp   # alphas[0]*0


# ----------------------------------------------------------------------------
if __name__ == "__main__":
    gate_channels = 16
    levels = 2                # accepted by the module; unused in this forward
    reduction_ratio = 4
    kernel_size = 3
    num_ops = 4

    key = jax.random.PRNGKey(0)
    kx, kw, kp = jax.random.split(key, 3)
    x = jax.random.normal(kx, (2, gate_channels, 16, 16), jnp.float32)   # NCHW
    alphas = jax.nn.softmax(jax.random.normal(kw, (num_ops,), jnp.float32))
    params = init_params(kp, gate_channels, reduction_ratio, kernel_size)

    out = search_cell_forward(x, alphas, params, kernel_size=kernel_size)
    out = jax.block_until_ready(out)

    ref = reference_forward(x, alphas, params, kernel_size=kernel_size)
    assert out.shape == x.shape, (out.shape, x.shape)
    err = float(jnp.max(jnp.abs(out - ref)))
    assert jnp.allclose(out, ref, atol=1e-4, rtol=1e-4), err
    print("KERNEL_OK")
</pallas_src>

<mosaic_0001>
module attributes {stable_mosaic.version = 11 : i64} {
  func.func @_mixed_op_kernel(%arg0: memref<4xf32, #tpu.memory_space<smem>>, %arg1: memref<1xf32, #tpu.memory_space<smem>>, %arg2: memref<2x16x256xf32, #tpu.memory_space<vmem>>, %arg3: memref<16x4xf32, #tpu.memory_space<vmem>>, %arg4: memref<1x4xf32, #tpu.memory_space<vmem>>, %arg5: memref<16x4xf32, #tpu.memory_space<vmem>>, %arg6: memref<16x1xf32, #tpu.memory_space<vmem>>, %arg7: memref<9x256xf32, #tpu.memory_space<vmem>>, %arg8: memref<9x256xf32, #tpu.memory_space<vmem>>, %arg9: memref<2x16x256xf32, #tpu.memory_space<vmem>>) attributes {dimension_semantics = [], scalar_prefetch = 0 : i64, scratch_operands = 0 : i64, tpu.core_type = #tpu.core_type<tc>} {
    %c1 = arith.constant 1 : index
    %0 = memref.load %arg0[%c1] : memref<4xf32, #tpu.memory_space<smem>>
    %c2 = arith.constant 2 : index
    %1 = memref.load %arg0[%c2] : memref<4xf32, #tpu.memory_space<smem>>
    %c3 = arith.constant 3 : index
    %2 = memref.load %arg0[%c3] : memref<4xf32, #tpu.memory_space<smem>>
    %c0 = arith.constant 0 : index
    %3 = memref.load %arg1[%c0] : memref<1xf32, #tpu.memory_space<smem>>
    %c0_0 = arith.constant 0 : index
    %c0_1 = arith.constant 0 : index
    %4 = vector.load %arg3[%c0_0, %c0_1] : memref<16x4xf32, #tpu.memory_space<vmem>>, vector<16x4xf32>
    %c0_2 = arith.constant 0 : index
    %c0_3 = arith.constant 0 : index
    %5 = vector.load %arg4[%c0_2, %c0_3] : memref<1x4xf32, #tpu.memory_space<vmem>>, vector<1x4xf32>
    %c0_4 = arith.constant 0 : index
    %c0_5 = arith.constant 0 : index
    %6 = vector.load %arg5[%c0_4, %c0_5] : memref<16x4xf32, #tpu.memory_space<vmem>>, vector<16x4xf32>
    %c0_6 = arith.constant 0 : index
    %c0_7 = arith.constant 0 : index
    %7 = vector.load %arg6[%c0_6, %c0_7] : memref<16x1xf32, #tpu.memory_space<vmem>>, vector<16x1xf32>
    %c0_8 = arith.constant 0 : index
    %c0_9 = arith.constant 0 : index
    %8 = vector.load %arg7[%c0_8, %c0_9] : memref<9x256xf32, #tpu.memory_space<vmem>>, vector<9x256xf32>
    %c0_10 = arith.constant 0 : index
    %c0_11 = arith.constant 0 : index
    %9 = vector.load %arg8[%c0_10, %c0_11] : memref<9x256xf32, #tpu.memory_space<vmem>>, vector<9x256xf32>
    %c0_12 = arith.constant 0 : index
    %c0_13 = arith.constant 0 : index
    %c0_14 = arith.constant 0 : index
    %10 = vector.load %arg2[%c0_12, %c0_13, %c0_14] : memref<2x16x256xf32, #tpu.memory_space<vmem>>, vector<1x16x256xf32>
    %11 = vector.shape_cast %10 : vector<1x16x256xf32> to vector<16x256xf32>
    %cst = arith.constant dense<0.000000e+00> : vector<16xf32>
    %12 = vector.multi_reduction <add>, %11, %cst [1] : vector<16x256xf32> to vector<16xf32>
    %13 = vector.shape_cast %12 : vector<16xf32> to vector<16x1xf32>
    %cst_15 = arith.constant 2.560000e+02 : f32
    %14 = vector.broadcast %cst_15 : f32 to vector<16x1xf32>
    %15 = arith.divf %13, %14 : vector<16x1xf32>
    %16 = vector.broadcast %15 : vector<16x1xf32> to vector<16x4xf32>
    %17 = arith.mulf %16, %4 : vector<16x4xf32>
    %cst_16 = arith.constant dense<0.000000e+00> : vector<4xf32>
    %18 = vector.multi_reduction <add>, %17, %cst_16 [0] : vector<16x4xf32> to vector<4xf32>
    %19 = vector.shape_cast %18 : vector<4xf32> to vector<1x4xf32>
    %20 = arith.addf %19, %5 : vector<1x4xf32>
    %cst_17 = arith.constant 0.000000e+00 : f32
    %21 = vector.broadcast %cst_17 : f32 to vector<1x4xf32>
    %22 = arith.maximumf %20, %21 : vector<1x4xf32>
    %23 = vector.broadcast %22 : vector<1x4xf32> to vector<16x4xf32>
    %24 = arith.mulf %23, %6 : vector<16x4xf32>
    %cst_18 = arith.constant dense<0.000000e+00> : vector<16xf32>
    %25 = vector.multi_reduction <add>, %24, %cst_18 [1] : vector<16x4xf32> to vector<16xf32>
    %26 = vector.shape_cast %25 : vector<16xf32> to vector<16x1xf32>
    %27 = arith.addf %26, %7 : vector<16x1xf32>
    %28 = arith.negf %27 : vector<16x1xf32>
    %29 = math.exp %28 : vector<16x1xf32>
    %cst_19 = arith.constant 1.000000e+00 : f32
    %30 = vector.broadcast %cst_19 : f32 to vector<16x1xf32>
    %31 = arith.addf %30, %29 : vector<16x1xf32>
    %32 = arith.divf %30, %31 : vector<16x1xf32>
    %cst_20 = arith.constant dense<0.000000e+00> : vector<256xf32>
    %33 = vector.multi_reduction <add>, %11, %cst_20 [0] : vector<16x256xf32> to vector<256xf32>
    %34 = vector.shape_cast %33 : vector<256xf32> to vector<1x256xf32>
    %cst_21 = arith.constant 1.600000e+01 : f32
    %35 = vector.broadcast %cst_21 : f32 to vector<1x256xf32>
    %36 = arith.divf %34, %35 : vector<1x256xf32>
    %cst_22 = arith.constant dense<0xFF800000> : vector<256xf32>
    %37 = vector.multi_reduction <maximumf>, %11, %cst_22 [0] : vector<16x256xf32> to vector<256xf32>
    %38 = vector.shape_cast %37 : vector<256xf32> to vector<1x256xf32>
    %cst_23 = arith.constant 0.000000e+00 : f32
    %39 = vector.broadcast %cst_23 : f32 to vector<1x256xf32>
    %40 = vector.broadcast %3 : f32 to vector<1x256xf32>
    %41 = arith.addf %39, %40 : vector<1x256xf32>
    %c17_i32 = arith.constant 17 : i32
    %42 = tpu.dynamic_rotate %36 by %c17_i32 dim 1 : vector<1x256xf32>, i32 -> vector<1x256xf32>
    %c17_i32_24 = arith.constant 17 : i32
    %43 = tpu.dynamic_rotate %38 by %c17_i32_24 dim 1 : vector<1x256xf32>, i32 -> vector<1x256xf32>
    %44 = vector.extract_strided_slice %8 {offsets = [0, 0], sizes = [1, 256], strides = [1, 1]} : vector<9x256xf32> to vector<1x256xf32>
    %45 = arith.mulf %42, %44 : vector<1x256xf32>
    %46 = arith.addf %41, %45 : vector<1x256xf32>
    %47 = vector.extract_strided_slice %9 {offsets = [0, 0], sizes = [1, 256], strides = [1, 1]} : vector<9x256xf32> to vector<1x256xf32>
    %48 = arith.mulf %43, %47 : vector<1x256xf32>
    %49 = arith.addf %46, %48 : vector<1x256xf32>
    %c16_i32 = arith.constant 16 : i32
    %50 = tpu.dynamic_rotate %36 by %c16_i32 dim 1 : vector<1x256xf32>, i32 -> vector<1x256xf32>
    %c16_i32_25 = arith.constant 16 : i32
    %51 = tpu.dynamic_rotate %38 by %c16_i32_25 dim 1 : vector<1x256xf32>, i32 -> vector<1x256xf32>
    %52 = vector.extract_strided_slice %8 {offsets = [1, 0], sizes = [1, 256], strides = [1, 1]} : vector<9x256xf32> to vector<1x256xf32>
    %53 = arith.mulf %50, %52 : vector<1x256xf32>
    %54 = arith.addf %49, %53 : vector<1x256xf32>
    %55 = vector.extract_strided_slice %9 {offsets = [1, 0], sizes = [1, 256], strides = [1, 1]} : vector<9x256xf32> to vector<1x256xf32>
    %56 = arith.mulf %51, %55 : vector<1x256xf32>
    %57 = arith.addf %54, %56 : vector<1x256xf32>
    %c15_i32 = arith.constant 15 : i32
    %58 = tpu.dynamic_rotate %36 by %c15_i32 dim 1 : vector<1x256xf32>, i32 -> vector<1x256xf32>
    %c15_i32_26 = arith.constant 15 : i32
    %59 = tpu.dynamic_rotate %38 by %c15_i32_26 dim 1 : vector<1x256xf32>, i32 -> vector<1x256xf32>
    %60 = vector.extract_strided_slice %8 {offsets = [2, 0], sizes = [1, 256], strides = [1, 1]} : vector<9x256xf32> to vector<1x256xf32>
    %61 = arith.mulf %58, %60 : vector<1x256xf32>
    %62 = arith.addf %57, %61 : vector<1x256xf32>
    %63 = vector.extract_strided_slice %9 {offsets = [2, 0], sizes = [1, 256], strides = [1, 1]} : vector<9x256xf32> to vector<1x256xf32>
    %64 = arith.mulf %59, %63 : vector<1x256xf32>
    %65 = arith.addf %62, %64 : vector<1x256xf32>
    %c1_i32 = arith.constant 1 : i32
    %66 = tpu.dynamic_rotate %36 by %c1_i32 dim 1 : vector<1x256xf32>, i32 -> vector<1x256xf32>
    %c1_i32_27 = arith.constant 1 : i32
    %67 = tpu.dynamic_rotate %38 by %c1_i32_27 dim 1 : vector<1x256xf32>, i32 -> vector<1x256xf32>
    %68 = vector.extract_strided_slice %8 {offsets = [3, 0], sizes = [1, 256], strides = [1, 1]} : vector<9x256xf32> to vector<1x256xf32>
    %69 = arith.mulf %66, %68 : vector<1x256xf32>
    %70 = arith.addf %65, %69 : vector<1x256xf32>
    %71 = vector.extract_strided_slice %9 {offsets = [3, 0], sizes = [1, 256], strides = [1, 1]} : vector<9x256xf32> to vector<1x256xf32>
    %72 = arith.mulf %67, %71 : vector<1x256xf32>
    %73 = arith.addf %70, %72 : vector<1x256xf32>
    %74 = vector.extract_strided_slice %8 {offsets = [4, 0], sizes = [1, 256], strides = [1, 1]} : vector<9x256xf32> to vector<1x256xf32>
    %75 = arith.mulf %36, %74 : vector<1x256xf32>
    %76 = arith.addf %73, %75 : vector<1x256xf32>
    %77 = vector.extract_strided_slice %9 {offsets = [4, 0], sizes = [1, 256], strides = [1, 1]} : vector<9x256xf32> to vector<1x256xf32>
    %78 = arith.mulf %38, %77 : vector<1x256xf32>
    %79 = arith.addf %76, %78 : vector<1x256xf32>
    %c255_i32 = arith.constant 255 : i32
    %80 = tpu.dynamic_rotate %36 by %c255_i32 dim 1 : vector<1x256xf32>, i32 -> vector<1x256xf32>
    %c255_i32_28 = arith.constant 255 : i32
    %81 = tpu.dynamic_rotate %38 by %c255_i32_28 dim 1 : vector<1x256xf32>, i32 -> vector<1x256xf32>
    %82 = vector.extract_strided_slice %8 {offsets = [5, 0], sizes = [1, 256], strides = [1, 1]} : vector<9x256xf32> to vector<1x256xf32>
    %83 = arith.mulf %80, %82 : vector<1x256xf32>
    %84 = arith.addf %79, %83 : vector<1x256xf32>
    %85 = vector.extract_strided_slice %9 {offsets = [5, 0], sizes = [1, 256], strides = [1, 1]} : vector<9x256xf32> to vector<1x256xf32>
    %86 = arith.mulf %81, %85 : vector<1x256xf32>
    %87 = arith.addf %84, %86 : vector<1x256xf32>
    %c241_i32 = arith.constant 241 : i32
    %88 = tpu.dynamic_rotate %36 by %c241_i32 dim 1 : vector<1x256xf32>, i32 -> vector<1x256xf32>
    %c241_i32_29 = arith.constant 241 : i32
    %89 = tpu.dynamic_rotate %38 by %c241_i32_29 dim 1 : vector<1x256xf32>, i32 -> vector<1x256xf32>
    %90 = vector.extract_strided_slice %8 {offsets = [6, 0], sizes = [1, 256], strides = [1, 1]} : vector<9x256xf32> to vector<1x256xf32>
    %91 = arith.mulf %88, %90 : vector<1x256xf32>
    %92 = arith.addf %87, %91 : vector<1x256xf32>
    %93 = vector.extract_strided_slice %9 {offsets = [6, 0], sizes = [1, 256], strides = [1, 1]} : vector<9x256xf32> to vector<1x256xf32>
    %94 = arith.mulf %89, %93 : vector<1x256xf32>
    %95 = arith.addf %92, %94 : vector<1x256xf32>
    %c240_i32 = arith.constant 240 : i32
    %96 = tpu.dynamic_rotate %36 by %c240_i32 dim 1 : vector<1x256xf32>, i32 -> vector<1x256xf32>
    %c240_i32_30 = arith.constant 240 : i32
    %97 = tpu.dynamic_rotate %38 by %c240_i32_30 dim 1 : vector<1x256xf32>, i32 -> vector<1x256xf32>
    %98 = vector.extract_strided_slice %8 {offsets = [7, 0], sizes = [1, 256], strides = [1, 1]} : vector<9x256xf32> to vector<1x256xf32>
    %99 = arith.mulf %96, %98 : vector<1x256xf32>
    %100 = arith.addf %95, %99 : vector<1x256xf32>
    %101 = vector.extract_strided_slice %9 {offsets = [7, 0], sizes = [1, 256], strides = [1, 1]} : vector<9x256xf32> to vector<1x256xf32>
    %102 = arith.mulf %97, %101 : vector<1x256xf32>
    %103 = arith.addf %100, %102 : vector<1x256xf32>
    %c239_i32 = arith.constant 239 : i32
    %104 = tpu.dynamic_rotate %36 by %c239_i32 dim 1 : vector<1x256xf32>, i32 -> vector<1x256xf32>
    %c239_i32_31 = arith.constant 239 : i32
    %105 = tpu.dynamic_rotate %38 by %c239_i32_31 dim 1 : vector<1x256xf32>, i32 -> vector<1x256xf32>
    %106 = vector.extract_strided_slice %8 {offsets = [8, 0], sizes = [1, 256], strides = [1, 1]} : vector<9x256xf32> to vector<1x256xf32>
    %107 = arith.mulf %104, %106 : vector<1x256xf32>
    %108 = arith.addf %103, %107 : vector<1x256xf32>
    %109 = vector.extract_strided_slice %9 {offsets = [8, 0], sizes = [1, 256], strides = [1, 1]} : vector<9x256xf32> to vector<1x256xf32>
    %110 = arith.mulf %105, %109 : vector<1x256xf32>
    %111 = arith.addf %108, %110 : vector<1x256xf32>
    %112 = arith.negf %111 : vector<1x256xf32>
    %113 = math.exp %112 : vector<1x256xf32>
    %cst_32 = arith.constant 1.000000e+00 : f32
    %114 = vector.broadcast %cst_32 : f32 to vector<1x256xf32>
    %115 = arith.addf %114, %113 : vector<1x256xf32>
    %116 = arith.divf %114, %115 : vector<1x256xf32>
    %117 = vector.broadcast %1 : f32 to vector<16x1xf32>
    %118 = arith.mulf %117, %32 : vector<16x1xf32>
    %119 = vector.broadcast %0 : f32 to vector<16x1xf32>
    %120 = arith.addf %119, %118 : vector<16x1xf32>
    %121 = vector.broadcast %2 : f32 to vector<1x256xf32>
    %122 = arith.mulf %121, %116 : vector<1x256xf32>
    %123 = vector.broadcast %120 : vector<16x1xf32> to vector<16x256xf32>
    %124 = vector.broadcast %122 : vector<1x256xf32> to vector<16x256xf32>
    %125 = arith.addf %123, %124 : vector<16x256xf32>
    %126 = arith.mulf %11, %125 : vector<16x256xf32>
    %c0_33 = arith.constant 0 : index
    %c0_34 = arith.constant 0 : index
    %c0_35 = arith.constant 0 : index
    %127 = vector.load %arg9[%c0_33, %c0_34, %c0_35] : memref<2x16x256xf32, #tpu.memory_space<vmem>>, vector<1x16x256xf32>
    %128 = vector.shape_cast %127 : vector<1x16x256xf32> to vector<16x256xf32>
    %129 = vector.shape_cast %126 : vector<16x256xf32> to vector<1x16x256xf32>
    tpu.vector_store %arg9[%c0_33, %c0_34, %c0_35], %129 {strides = array<i32>} : memref<2x16x256xf32, #tpu.memory_space<vmem>>, vector<1x16x256xf32>,
    %c1_36 = arith.constant 1 : index
    %c0_37 = arith.constant 0 : index
    %c0_38 = arith.constant 0 : index
    %130 = vector.load %arg2[%c1_36, %c0_37, %c0_38] : memref<2x16x256xf32, #tpu.memory_space<vmem>>, vector<1x16x256xf32>
    %131 = vector.shape_cast %130 : vector<1x16x256xf32> to vector<16x256xf32>
    %cst_39 = arith.constant dense<0.000000e+00> : vector<16xf32>
    %132 = vector.multi_reduction <add>, %131, %cst_39 [1] : vector<16x256xf32> to vector<16xf32>
    %133 = vector.shape_cast %132 : vector<16xf32> to vector<16x1xf32>
    %cst_40 = arith.constant 2.560000e+02 : f32
    %134 = vector.broadcast %cst_40 : f32 to vector<16x1xf32>
    %135 = arith.divf %133, %134 : vector<16x1xf32>
    %136 = vector.broadcast %135 : vector<16x1xf32> to vector<16x4xf32>
    %137 = arith.mulf %136, %4 : vector<16x4xf32>
    %cst_41 = arith.constant dense<0.000000e+00> : vector<4xf32>
    %138 = vector.multi_reduction <add>, %137, %cst_41 [0] : vector<16x4xf32> to vector<4xf32>
    %139 = vector.shape_cast %138 : vector<4xf32> to vector<1x4xf32>
    %140 = arith.addf %139, %5 : vector<1x4xf32>
    %cst_42 = arith.constant 0.000000e+00 : f32
    %141 = vector.broadcast %cst_42 : f32 to vector<1x4xf32>
    %142 = arith.maximumf %140, %141 : vector<1x4xf32>
    %143 = vector.broadcast %142 : vector<1x4xf32> to vector<16x4xf32>
    %144 = arith.mulf %143, %6 : vector<16x4xf32>
    %cst_43 = arith.constant dense<0.000000e+00> : vector<16xf32>
    %145 = vector.multi_reduction <add>, %144, %cst_43 [1] : vector<16x4xf32> to vector<16xf32>
    %146 = vector.shape_cast %145 : vector<16xf32> to vector<16x1xf32>
    %147 = arith.addf %146, %7 : vector<16x1xf32>
    %148 = arith.negf %147 : vector<16x1xf32>
    %149 = math.exp %148 : vector<16x1xf32>
    %cst_44 = arith.constant 1.000000e+00 : f32
    %150 = vector.broadcast %cst_44 : f32 to vector<16x1xf32>
    %151 = arith.addf %150, %149 : vector<16x1xf32>
    %152 = arith.divf %150, %151 : vector<16x1xf32>
    %cst_45 = arith.constant dense<0.000000e+00> : vector<256xf32>
    %153 = vector.multi_reduction <add>, %131, %cst_45 [0] : vector<16x256xf32> to vector<256xf32>
    %154 = vector.shape_cast %153 : vector<256xf32> to vector<1x256xf32>
    %cst_46 = arith.constant 1.600000e+01 : f32
    %155 = vector.broadcast %cst_46 : f32 to vector<1x256xf32>
    %156 = arith.divf %154, %155 : vector<1x256xf32>
    %cst_47 = arith.constant dense<0xFF800000> : vector<256xf32>
    %157 = vector.multi_reduction <maximumf>, %131, %cst_47 [0] : vector<16x256xf32> to vector<256xf32>
    %158 = vector.shape_cast %157 : vector<256xf32> to vector<1x256xf32>
    %cst_48 = arith.constant 0.000000e+00 : f32
    %159 = vector.broadcast %cst_48 : f32 to vector<1x256xf32>
    %160 = vector.broadcast %3 : f32 to vector<1x256xf32>
    %161 = arith.addf %159, %160 : vector<1x256xf32>
    %c17_i32_49 = arith.constant 17 : i32
    %162 = tpu.dynamic_rotate %156 by %c17_i32_49 dim 1 : vector<1x256xf32>, i32 -> vector<1x256xf32>
    %c17_i32_50 = arith.constant 17 : i32
    %163 = tpu.dynamic_rotate %158 by %c17_i32_50 dim 1 : vector<1x256xf32>, i32 -> vector<1x256xf32>
    %164 = vector.extract_strided_slice %8 {offsets = [0, 0], sizes = [1, 256], strides = [1, 1]} : vector<9x256xf32> to vector<1x256xf32>
    %165 = arith.mulf %162, %164 : vector<1x256xf32>
    %166 = arith.addf %161, %165 : vector<1x256xf32>
    %167 = vector.extract_strided_slice %9 {offsets = [0, 0], sizes = [1, 256], strides = [1, 1]} : vector<9x256xf32> to vector<1x256xf32>
    %168 = arith.mulf %163, %167 : vector<1x256xf32>
    %169 = arith.addf %166, %168 : vector<1x256xf32>
    %c16_i32_51 = arith.constant 16 : i32
    %170 = tpu.dynamic_rotate %156 by %c16_i32_51 dim 1 : vector<1x256xf32>, i32 -> vector<1x256xf32>
    %c16_i32_52 = arith.constant 16 : i32
    %171 = tpu.dynamic_rotate %158 by %c16_i32_52 dim 1 : vector<1x256xf32>, i32 -> vector<1x256xf32>
    %172 = vector.extract_strided_slice %8 {offsets = [1, 0], sizes = [1, 256], strides = [1, 1]} : vector<9x256xf32> to vector<1x256xf32>
    %173 = arith.mulf %170, %172 : vector<1x256xf32>
    %174 = arith.addf %169, %173 : vector<1x256xf32>
    %175 = vector.extract_strided_slice %9 {offsets = [1, 0], sizes = [1, 256], strides = [1, 1]} : vector<9x256xf32> to vector<1x256xf32>
    %176 = arith.mulf %171, %175 : vector<1x256xf32>
    %177 = arith.addf %174, %176 : vector<1x256xf32>
    %c15_i32_53 = arith.constant 15 : i32
    %178 = tpu.dynamic_rotate %156 by %c15_i32_53 dim 1 : vector<1x256xf32>, i32 -> vector<1x256xf32>
    %c15_i32_54 = arith.constant 15 : i32
    %179 = tpu.dynamic_rotate %158 by %c15_i32_54 dim 1 : vector<1x256xf32>, i32 -> vector<1x256xf32>
    %180 = vector.extract_strided_slice %8 {offsets = [2, 0], sizes = [1, 256], strides = [1, 1]} : vector<9x256xf32> to vector<1x256xf32>
    %181 = arith.mulf %178, %180 : vector<1x256xf32>
    %182 = arith.addf %177, %181 : vector<1x256xf32>
    %183 = vector.extract_strided_slice %9 {offsets = [2, 0], sizes = [1, 256], strides = [1, 1]} : vector<9x256xf32> to vector<1x256xf32>
    %184 = arith.mulf %179, %183 : vector<1x256xf32>
    %185 = arith.addf %182, %184 : vector<1x256xf32>
    %c1_i32_55 = arith.constant 1 : i32
    %186 = tpu.dynamic_rotate %156 by %c1_i32_55 dim 1 : vector<1x256xf32>, i32 -> vector<1x256xf32>
    %c1_i32_56 = arith.constant 1 : i32
    %187 = tpu.dynamic_rotate %158 by %c1_i32_56 dim 1 : vector<1x256xf32>, i32 -> vector<1x256xf32>
    %188 = vector.extract_strided_slice %8 {offsets = [3, 0], sizes = [1, 256], strides = [1, 1]} : vector<9x256xf32> to vector<1x256xf32>
    %189 = arith.mulf %186, %188 : vector<1x256xf32>
    %190 = arith.addf %185, %189 : vector<1x256xf32>
    %191 = vector.extract_strided_slice %9 {offsets = [3, 0], sizes = [1, 256], strides = [1, 1]} : vector<9x256xf32> to vector<1x256xf32>
    %192 = arith.mulf %187, %191 : vector<1x256xf32>
    %193 = arith.addf %190, %192 : vector<1x256xf32>
    %194 = vector.extract_strided_slice %8 {offsets = [4, 0], sizes = [1, 256], strides = [1, 1]} : vector<9x256xf32> to vector<1x256xf32>
    %195 = arith.mulf %156, %194 : vector<1x256xf32>
    %196 = arith.addf %193, %195 : vector<1x256xf32>
    %197 = vector.extract_strided_slice %9 {offsets = [4, 0], sizes = [1, 256], strides = [1, 1]} : vector<9x256xf32> to vector<1x256xf32>
    %198 = arith.mulf %158, %197 : vector<1x256xf32>
    %199 = arith.addf %196, %198 : vector<1x256xf32>
    %c255_i32_57 = arith.constant 255 : i32
    %200 = tpu.dynamic_rotate %156 by %c255_i32_57 dim 1 : vector<1x256xf32>, i32 -> vector<1x256xf32>
    %c255_i32_58 = arith.constant 255 : i32
    %201 = tpu.dynamic_rotate %158 by %c255_i32_58 dim 1 : vector<1x256xf32>, i32 -> vector<1x256xf32>
    %202 = vector.extract_strided_slice %8 {offsets = [5, 0], sizes = [1, 256], strides = [1, 1]} : vector<9x256xf32> to vector<1x256xf32>
    %203 = arith.mulf %200, %202 : vector<1x256xf32>
    %204 = arith.addf %199, %203 : vector<1x256xf32>
    %205 = vector.extract_strided_slice %9 {offsets = [5, 0], sizes = [1, 256], strides = [1, 1]} : vector<9x256xf32> to vector<1x256xf32>
    %206 = arith.mulf %201, %205 : vector<1x256xf32>
    %207 = arith.addf %204, %206 : vector<1x256xf32>
    %c241_i32_59 = arith.constant 241 : i32
    %208 = tpu.dynamic_rotate %156 by %c241_i32_59 dim 1 : vector<1x256xf32>, i32 -> vector<1x256xf32>
    %c241_i32_60 = arith.constant 241 : i32
    %209 = tpu.dynamic_rotate %158 by %c241_i32_60 dim 1 : vector<1x256xf32>, i32 -> vector<1x256xf32>
    %210 = vector.extract_strided_slice %8 {offsets = [6, 0], sizes = [1, 256], strides = [1, 1]} : vector<9x256xf32> to vector<1x256xf32>
    %211 = arith.mulf %208, %210 : vector<1x256xf32>
    %212 = arith.addf %207, %211 : vector<1x256xf32>
    %213 = vector.extract_strided_slice %9 {offsets = [6, 0], sizes = [1, 256], strides = [1, 1]} : vector<9x256xf32> to vector<1x256xf32>
    %214 = arith.mulf %209, %213 : vector<1x256xf32>
    %215 = arith.addf %212, %214 : vector<1x256xf32>
    %c240_i32_61 = arith.constant 240 : i32
    %216 = tpu.dynamic_rotate %156 by %c240_i32_61 dim 1 : vector<1x256xf32>, i32 -> vector<1x256xf32>
    %c240_i32_62 = arith.constant 240 : i32
    %217 = tpu.dynamic_rotate %158 by %c240_i32_62 dim 1 : vector<1x256xf32>, i32 -> vector<1x256xf32>
    %218 = vector.extract_strided_slice %8 {offsets = [7, 0], sizes = [1, 256], strides = [1, 1]} : vector<9x256xf32> to vector<1x256xf32>
    %219 = arith.mulf %216, %218 : vector<1x256xf32>
    %220 = arith.addf %215, %219 : vector<1x256xf32>
    %221 = vector.extract_strided_slice %9 {offsets = [7, 0], sizes = [1, 256], strides = [1, 1]} : vector<9x256xf32> to vector<1x256xf32>
    %222 = arith.mulf %217, %221 : vector<1x256xf32>
    %223 = arith.addf %220, %222 : vector<1x256xf32>
    %c239_i32_63 = arith.constant 239 : i32
    %224 = tpu.dynamic_rotate %156 by %c239_i32_63 dim 1 : vector<1x256xf32>, i32 -> vector<1x256xf32>
    %c239_i32_64 = arith.constant 239 : i32
    %225 = tpu.dynamic_rotate %158 by %c239_i32_64 dim 1 : vector<1x256xf32>, i32 -> vector<1x256xf32>
    %226 = vector.extract_strided_slice %8 {offsets = [8, 0], sizes = [1, 256], strides = [1, 1]} : vector<9x256xf32> to vector<1x256xf32>
    %227 = arith.mulf %224, %226 : vector<1x256xf32>
    %228 = arith.addf %223, %227 : vector<1x256xf32>
    %229 = vector.extract_strided_slice %9 {offsets = [8, 0], sizes = [1, 256], strides = [1, 1]} : vector<9x256xf32> to vector<1x256xf32>
    %230 = arith.mulf %225, %229 : vector<1x256xf32>
    %231 = arith.addf %228, %230 : vector<1x256xf32>
    %232 = arith.negf %231 : vector<1x256xf32>
    %233 = math.exp %232 : vector<1x256xf32>
    %cst_65 = arith.constant 1.000000e+00 : f32
    %234 = vector.broadcast %cst_65 : f32 to vector<1x256xf32>
    %235 = arith.addf %234, %233 : vector<1x256xf32>
    %236 = arith.divf %234, %235 : vector<1x256xf32>
    %237 = vector.broadcast %1 : f32 to vector<16x1xf32>
    %238 = arith.mulf %237, %152 : vector<16x1xf32>
    %239 = vector.broadcast %0 : f32 to vector<16x1xf32>
    %240 = arith.addf %239, %238 : vector<16x1xf32>
    %241 = vector.broadcast %2 : f32 to vector<1x256xf32>
    %242 = arith.mulf %241, %236 : vector<1x256xf32>
    %243 = vector.broadcast %240 : vector<16x1xf32> to vector<16x256xf32>
    %244 = vector.broadcast %242 : vector<1x256xf32> to vector<16x256xf32>
    %245 = arith.addf %243, %244 : vector<16x256xf32>
    %246 = arith.mulf %131, %245 : vector<16x256xf32>
    %c1_66 = arith.constant 1 : index
    %c0_67 = arith.constant 0 : index
    %c0_68 = arith.constant 0 : index
    %247 = vector.load %arg9[%c1_66, %c0_67, %c0_68] : memref<2x16x256xf32, #tpu.memory_space<vmem>>, vector<1x16x256xf32>
    %248 = vector.shape_cast %247 : vector<1x16x256xf32> to vector<16x256xf32>
    %249 = vector.shape_cast %246 : vector<16x256xf32> to vector<1x16x256xf32>
    tpu.vector_store %arg9[%c1_66, %c0_67, %c0_68], %249 {strides = array<i32>} : memref<2x16x256xf32, #tpu.memory_space<vmem>>, vector<1x16x256xf32>,
    return
  }
}

</mosaic_0001>

<bundles_post_ra>
// kernel: tpu_custom_call.1
= control target key start
LH: loop header
LB: loop body
LE: loop exit
PB: predicated region body
PF: predicated region fallthrough
CT: control target
= control target key end

     0   :  { %15 = vsyncpa [#allocation6], 0  ;;  %s1522_s0 = inlined_call_operand.hbm [shape: f32[4], index: 0, kind: input, shape index: {}]   ;;  %s1523_s1 = inlined_call_operand.<no memory space> [shape: f32[1], index: 1, kind: input, shape index: {}]   ;;  %s1524_s2 = inlined_call_operand.vmem [shape: f32[2,16,256], index: 2, kind: input, shape index: {}]   ;;  %s1525_s3 = inlined_call_operand.vmem [shape: f32[16,4], index: 3, kind: input, shape index: {}]   ;;  %s1526_s4 = inlined_call_operand.hbm [shape: f32[1,4], index: 4, kind: input, shape index: {}]   ;;  %s1527_s5 = inlined_call_operand.vmem [shape: f32[16,4], index: 5, kind: input, shape index: {}]   ;;  %s1528_s6 = inlined_call_operand.vmem [shape: f32[16,1], index: 6, kind: input, shape index: {}]   ;;  %s1529_s7 = inlined_call_operand.hbm [shape: f32[9,256], index: 7, kind: input, shape index: {}]   ;;  %s1530_s8 = inlined_call_operand.hbm [shape: f32[9,256], index: 8, kind: input, shape index: {}]   ;;  %s1531_s9 = inlined_call_operand.hbm [shape: f32[2,16,256], index: 9, kind: output, shape index: {}]  }
   0x1   :  { %16 = vsyncpa [#allocation4], 0 }
   0x2   :  { %17 = vsyncpa [#allocation9], 0 }
   0x3   :  { %18 = vsyncpa [#allocation5], 0  ;;  %s990_s30 = smov [#allocation8]   ;;  %s884_s13 = scalar_lea.hbm %s1529_s7, 512 }
   0x4   :  { %s52_s10 = sshll.u32 %s990_s30, 4  ;;  %p885_p0 = scmp.ne.s32.totalorder %s1529_s7, %s884_s13  ;;  %s53_s10 = int_to_ptr.vmem [resolvable:$true] %s52_s10 }
   0x5   :  { %p888_p1 = scmp.lt.u32.totalorder %s884_s13, %s1529_s7 }
   0x7   :  { %p890_p2 = pnand %p888_p1, %p885_p0 }
   0x9   :  { %893 = shalt.err (!%p890_p2)
}
   0xa   :  { %s894_s18 = scalar_lea.vmem %s53_s10, 512  ;;  %p899_p4 = scmp.lt.s32.totalorder %s53_s10, %s53_s10 }
   0xb   :  { %p895_p3 = scmp.ne.s32.totalorder %s53_s10, %s894_s18  ;;  %p900_p5 = scmp.lt.s32.totalorder %s894_s18, %s894_s18 }
   0xd   :  { %p901_p6 = por %p900_p5, %p899_p4 }
   0xf   :  { %p902_p7 = pnand %p901_p6, %p895_p3 }
  0x11   :  { %905 = shalt.err (!%p902_p7)
}
  0x12   :  { %s991_s19 = smov 256   ;;  %s992_s20 = smov 16  }
  0x13   :  { %58 = dma.hbm_to_vmem [thread:$0]  %s1529_s7, 512, %s53_s10, [#allocation9], %s991_s19, %s991_s19, %s992_s20  }
  0x14   :  { %s906_s25 = scalar_lea.hbm %s1522_s0, 16 }
  0x15   :  { %p907_p8 = scmp.ne.s32.totalorder %s1522_s0, %s906_s25  ;;  %p910_p9 = scmp.lt.u32.totalorder %s906_s25, %s1522_s0 }
  0x17   :  { %p912_p10 = pnand %p910_p9, %p907_p8 }
  0x19   :  { %915 = shalt.err (!%p912_p10)
}
  0x1a   :  { %s993_s30 = smov [#allocation3]   ;;  %s994_s7 = smov [#allocation7]  }
  0x1b   :  { %26 = dma.hbm_to_smem %s1522_s0, 16, %s993_s30, [#allocation6]  }
  0x1c   :  { %s39_s10 = sshll.u32 %s994_s7, 4  ;;  %s995_s13 = smov [#allocation10]   ;;  %s40_s10 = int_to_ptr.vmem [resolvable:$true] %s39_s10 }
  0x1d   :  { %s64_s14 = sshll.u32 %s995_s13, 4  ;;  %s916_s17 = scalar_lea.hbm %s1526_s4, 16  ;;  %s1082_s14 = int_to_ptr.vmem [resolvable:$true] %s64_s14 }
  0x1e   :  { %p917_p11 = scmp.ne.s32.totalorder %s1526_s4, %s916_s17  ;;  %p920_p12 = scmp.lt.u32.totalorder %s916_s17, %s1526_s4 }
  0x20   :  { %p922_p13 = pnand %p920_p12, %p917_p11 }
  0x22   :  { %925 = shalt.err (!%p922_p13)
}
  0x23   :  { %s926_s0 = scalar_lea.vmem %s40_s10, 16  ;;  %s930_s24 = scalar_lea.vmem %s40_s10, 32 }
  0x24   :  { %p927_p0 = scmp.ne.s32.totalorder %s40_s10, %s926_s0  ;;  %p931_p1 = scmp.lt.s32.totalorder %s40_s10, %s40_s10 }
  0x25   :  { %p932_p2 = scmp.lt.s32.totalorder %s930_s24, %s926_s0 }
  0x27   :  { %p933_p3 = por %p932_p2, %p931_p1 }
  0x29   :  { %p934_p4 = pnand %p933_p3, %p927_p0 }
  0x2b   :  { %937 = shalt.err (!%p934_p4)
}
  0x2c   :  { %42 = dma.hbm_to_vmem [thread:$0]  %s1526_s4, 16, %s40_s10, [#allocation4]  }
  0x2d   :  { %s938_s29 = scalar_lea.hbm %s1530_s8, 512 }
  0x2e   :  { %p939_p5 = scmp.ne.s32.totalorder %s1530_s8, %s938_s29  ;;  %p942_p6 = scmp.lt.u32.totalorder %s938_s29, %s1530_s8 }
  0x30   :  { %p944_p7 = pnand %p942_p6, %p939_p5 }
  0x32   :  { %947 = shalt.err (!%p944_p7)
}
  0x33   :  { %s948_s13 = scalar_lea.vmem %s1082_s14, 512  ;;  %p953_p9 = scmp.lt.s32.totalorder %s1082_s14, %s1082_s14 }
  0x34   :  { %p949_p8 = scmp.ne.s32.totalorder %s1082_s14, %s948_s13  ;;  %p954_p10 = scmp.lt.s32.totalorder %s948_s13, %s948_s13 }
  0x36   :  { %p955_p11 = por %p954_p10, %p953_p9 }
  0x38   :  { %p956_p12 = pnand %p955_p11, %p949_p8 }
  0x3a   :  { %959 = shalt.err (!%p956_p12)
}
  0x3b   :  { %70 = dma.hbm_to_vmem [thread:$0]  %s1530_s8, 512, %s1082_s14, [#allocation9], %s991_s19, %s991_s19, %s992_s20  }
  0x3c   :  { %982 = dma.done.wait [#allocation6], 16  }
  0x3d   :  { %983 = vsyncadd [#allocation6], 4294967280 }
  0x3e   :  { %984 = dma.done.wait [#allocation4], 16  }
  0x3f   :  { %985 = vsyncadd [#allocation4], 4294967280 }
  0x40   :  { %986 = dma.done.wait [#allocation9], 1024  }
  0x41   :  { %987 = vsyncadd [#allocation9], 4294966272 }
  0x42   :  { %83 = sfence }
  0x43   :  { %v819_v0 = vld [vmem:[%s1524_s2 + $0x20] sm:$0xff]  ;;  %v820_v1 = vld [vmem:[%s1524_s2 + $0x28] sm:$0xff]  ;;  %v821_v5 = vld [vmem:[%s1524_s2 + $0x30] sm:$0xff]  ;;  %s996_s30 = smov 17   ;;  %s997_s11 = smov 15   ;;  %vm118_vm0 = vcmask 31744  }
  0x44   :  { %v103_v2 = vld [vmem:[%s1524_s2] sm:$0xff]  ;;  %v487_v3 = vadd.f32 %v820_v1, %v819_v0  ;;  %v104_v4 = vld [vmem:[%s1524_s2 + $0x8] sm:$0xff]  ;;  %v822_v6 = vld [vmem:[%s1524_s2 + $0x38] sm:$0xff]  ;;  %v534_v24 = vadd.f32 %v821_v5, %v819_v0  ;;  %v550_v41 = vmax.f32 %v819_v0, %v821_v5  ;;  %s998_s12 = smov 1   ;;  %s999_s7 = smov 127  }
  0x45   :  { %v107_v7 = vadd.f32 %v104_v4, %v103_v2  ;;  %v105_v8 = vld [vmem:[%s1524_s2 + $0x10] sm:$0xff]  ;;  %v106_v9 = vld [vmem:[%s1524_s2 + $0x18] sm:$0xff]  ;;  %v490_v10 = vadd.f32 %v822_v6, %v821_v5  ;;  %v541_v12 = vadd.f32 %v822_v6, %v820_v1  ;;  %v557_v29 = vmax.f32 %v820_v1, %v822_v6  ;;  %s1000_s13 = smov 113   ;;  %s1003_s8 = smov 111  }
  0x46   :  { %488 = vadd.xlane.f32.xlu1 %v487_v3  ;;  %v156_v11 = vadd.f32 %v105_v8, %v103_v2  ;;  %v110_v13 = vadd.f32 %v106_v9, %v105_v8  ;;  %v163_v14 = vadd.f32 %v106_v9, %v104_v4  ;;  %v180_v16 = vmax.f32 %v104_v4, %v106_v9  ;;  %s812_s25 = sld [smem:[#allocation3 + $0x1]]  ;;  %s814_s26 = sld [smem:[#allocation3 + $0x3]] }
  0x47   :  { %108 = vadd.xlane.f32.xlu0 %v107_v7  ;;  %v173_v18 = vmax.f32 %v103_v2, %v105_v8  ;;  %v542_v21 = vrot.slane %v541_v12, 4  ;;  %v535_v32 = vrot.slane %v534_v24, 4  ;;  %v558_v37 = vrot.slane %v557_v29, 4 }
  0x48   :  { %v157_v15 = vrot.slane %v156_v11, 4  ;;  %v164_v17 = vrot.slane %v163_v14, 4  ;;  %v181_v20 = vrot.slane %v180_v16, 4  ;;  %v551_v49 = vrot.slane %v550_v41, 4 }
  0x49   :  { %v174_v27 = vrot.slane %v173_v18, 4  ;;  %v543_v28 = vadd.f32 %v542_v21, %v541_v12  ;;  %v536_v40 = vadd.f32 %v535_v32, %v534_v24  ;;  %v559_v45 = vmax.f32 %v557_v29, %v558_v37  ;;  %v88_v12 = vld [vmem:[%s1525_s3] sm:$0xff] }
  0x4a   :  { %491 = vadd.xlane.f32.xlu1 %v490_v10  ;;  %v158_v19 = vadd.f32 %v157_v15, %v156_v11  ;;  %v165_v22 = vadd.f32 %v164_v17, %v163_v14  ;;  %v182_v23 = vmax.f32 %v180_v16, %v181_v20  ;;  %v552_v56 = vmax.f32 %v550_v41, %v551_v49  ;;  %v89_v17 = vld [vmem:[%s1525_s3 + $0x8] sm:$0xff]  ;;  %s1004_s3 = smov [#allocation11]  }
  0x4b   :  { %111 = vadd.xlane.f32.xlu0 %v110_v13  ;;  %v175_v35 = vmax.f32 %v173_v18, %v174_v27  ;;  %v544_v36 = vrot.slane %v543_v28, 2  ;;  %v537_v48 = vrot.slane %v536_v40, 2  ;;  %v560_v53 = vrot.slane %v559_v45, 2  ;;  %v1224_v27 = vld [vmem:[#allocation8 + $0x8] sm:$0xff]  ;;  %v1238_v41 = vld [vmem:[#allocation10] sm:$0xff]  ;;  %s798_s17 = sshll.u32 %s1004_s3, 4  ;;  %s799_s17 = int_to_ptr.vmem [resolvable:$true] %s798_s17 }
  0x4c   :  { %v159_v25 = vrot.slane %v158_v19, 2  ;;  %v166_v26 = vrot.slane %v165_v22, 2  ;;  %v183_v31 = vrot.slane %v182_v23, 2  ;;  %v553_v62 = vrot.slane %v552_v56, 2  ;;  %p965_p0 = scmp.lt.s32.totalorder %s799_s17, %s799_s17 }
  0x4d   :  { %v176_v43 = vrot.slane %v175_v35, 2  ;;  %v545_v44 = vadd.f32 %v544_v36, %v543_v28  ;;  %v538_v55 = vadd.f32 %v537_v48, %v536_v40  ;;  %v561_v60 = vmax.f32 %v559_v45, %v560_v53 }
  0x4e   :  { %v167_v30 = vadd.f32 %v166_v26, %v165_v22  ;;  %v160_v33 = vadd.f32 %v159_v25, %v158_v19  ;;  %v184_v39 = vmax.f32 %v182_v23, %v183_v31  ;;  %v554_v3 = vmax.f32 %v552_v56, %v553_v62  ;;  %v1222_v26 = vld [vmem:[#allocation8] sm:$0xff] }
  0x4f   :  { %v177_v51 = vmax.f32 %v175_v35, %v176_v43  ;;  %v546_v52 = vrot.slane %v545_v44, 1  ;;  %v539_v61 = vrot.slane %v538_v55, 1  ;;  %v562_v1 = vrot.slane %v561_v60, 1 }
  0x50   :  { %v168_v34 = vrot.slane %v167_v30, 1  ;;  %v161_v42 = vrot.slane %v160_v33, 1  ;;  %v185_v47 = vrot.slane %v184_v39, 1  ;;  %v555_v6 = vrot.slane %v554_v3, 1 }
  0x51   :  { %v178_v58 = vrot.slane %v177_v51, 1  ;;  %v547_v59 = vadd.f32 %v546_v52, %v545_v44  ;;  %v540_v2 = vadd.f32 %v539_v61, %v538_v55  ;;  %v1156_v4 = vmax.f32 %v561_v60, %v562_v1 }
  0x52   :  { %v169_v38 = vadd.f32 %v168_v34, %v167_v30  ;;  %v162_v50 = vadd.f32 %v161_v42, %v160_v33  ;;  %v1142_v54 = vmax.f32 %v184_v39, %v185_v47  ;;  %v1164_v7 = vmax.f32 %v554_v3, %v555_v6  ;;  %v1240_v42 = vld [vmem:[#allocation10 + $0x8] sm:$0xff] }
  0x53   :  { %v1148_v63 = vmax.f32 %v177_v51, %v178_v58  ;;  %v1151_v0 = vmul.f32 0.0625, %v547_v59  ;;  %v1159_v5 = vmul.f32 0.0625, %v540_v2  ;;  %v130_v11 = vlaneseq }
  0x54   :  { %v1140_v46 = vmul.f32 0.0625, %v169_v38  ;;  %v1145_v57 = vmul.f32 0.0625, %v162_v50  ;;  %v187_v30 = vstv %s1523_s1  ;;  %v227_v48 = vrot.slane %v1222_v26, 1 }
  0x55   :  { %v1215_v15 = vand.u32 127, %v130_v11  ;;  %v228_v52 = vrot.slane %v1224_v27, 1 }
  0x57   :  { %vm195_vm1 = vcmp.lt.s32.totalorder %v1215_v15, 17  ;;  %vm216_vm2 = vcmp.lt.s32.totalorder %v1215_v15, 16  ;;  %vm249_vm3 = vcmp.lt.s32.totalorder %v1215_v15, 15  ;;  %vm278_vm4 = vcmp.lt.s32.totalorder %v1215_v15, 1 }
  0x58   :  { %vm327_vm5 = vcmp.lt.s32.totalorder %v1215_v15, 127  ;;  %vm356_vm6 = vcmp.lt.s32.totalorder %v1215_v15, 113  ;;  %vm385_vm7 = vcmp.lt.s32.totalorder %v1215_v15, 112  ;;  %vm414_vm8 = vcmp.lt.s32.totalorder %v1215_v15, 111 }
  0x5b   :  { %191 = vrot.lane.b32.xlu1 %v1140_v46, %s996_s30 }
  0x5f   :  { %200 = vrot.lane.b32.xlu1 %v1142_v54, %s996_s30 }
  0x61   :  { %189 = vrot.lane.b32.xlu0 %v1145_v57, %s996_s30 }
  0x63   :  { %214 = vrot.lane.b32.xlu1 %v1140_v46, %s992_s20 }
  0x65   :  { %198 = vrot.lane.b32.xlu0 %v1148_v63, %s996_s30 }
  0x67   :  { %566 = vrot.lane.b32.xlu1 %v1151_v0, %s996_s30 }
  0x69   :  { %212 = vrot.lane.b32.xlu0 %v1145_v57, %s992_s20 }
  0x6b   :  { %572 = vrot.lane.b32.xlu1 %v1156_v4, %s996_s30 }
  0x6d   :  { %564 = vrot.lane.b32.xlu0 %v1159_v5, %s996_s30 }
  0x6f   :  { %586 = vrot.lane.b32.xlu1 %v1151_v0, %s992_s20 }
  0x71   :  { %570 = vrot.lane.b32.xlu0 %v1164_v7, %s996_s30 }
  0x73   :  { %221 = vrot.lane.b32.xlu1 %v1142_v54, %s992_s20 }
  0x75   :  { %584 = vrot.lane.b32.xlu0 %v1159_v5, %s992_s20 }
  0x77   :  { %592 = vrot.lane.b32.xlu1 %v1156_v4, %s992_s20 }
  0x79   :  { %219 = vrot.lane.b32.xlu0 %v1148_v63, %s992_s20 }
  0x7b   :  { %247 = vrot.lane.b32.xlu1 %v1140_v46, %s997_s11 }
  0x7d   :  { %590 = vrot.lane.b32.xlu0 %v1164_v7, %s992_s20 }
  0x7f   :  { %606 = vrot.lane.b32.xlu1 %v1151_v0, %s997_s11 }
  0x81   :  { %245 = vrot.lane.b32.xlu0 %v1145_v57, %s997_s11 }
  0x83   :  { %254 = vrot.lane.b32.xlu1 %v1142_v54, %s997_s11 }
  0x85   :  { %604 = vrot.lane.b32.xlu0 %v1159_v5, %s997_s11 }
  0x87   :  { %612 = vrot.lane.b32.xlu1 %v1156_v4, %s997_s11 }
  0x89   :  { %252 = vrot.lane.b32.xlu0 %v1148_v63, %s997_s11 }
  0x8b   :  { %276 = vrot.lane.b32.xlu1 %v1140_v46, %s998_s12 }
  0x8d   :  { %610 = vrot.lane.b32.xlu0 %v1164_v7, %s997_s11 }
  0x8f   :  { %626 = vrot.lane.b32.xlu1 %v1151_v0, %s998_s12 }
  0x91   :  { %274 = vrot.lane.b32.xlu0 %v1145_v57, %s998_s12 }
  0x93   :  { %283 = vrot.lane.b32.xlu1 %v1142_v54, %s998_s12 }
  0x95   :  { %624 = vrot.lane.b32.xlu0 %v1159_v5, %s998_s12 }
  0x97   :  { %632 = vrot.lane.b32.xlu1 %v1156_v4, %s998_s12 }
  0x99   :  { %281 = vrot.lane.b32.xlu0 %v1148_v63, %s998_s12 }
  0x9b   :  { %325 = vrot.lane.b32.xlu1 %v1140_v46, %s999_s7 }
  0x9d   :  { %630 = vrot.lane.b32.xlu0 %v1164_v7, %s998_s12 }
  0x9f   :  { %666 = vrot.lane.b32.xlu1 %v1151_v0, %s999_s7 }
  0xa1   :  { %323 = vrot.lane.b32.xlu0 %v1145_v57, %s999_s7 }
  0xa3   :  { %332 = vrot.lane.b32.xlu1 %v1142_v54, %s999_s7 }
  0xa5   :  { %664 = vrot.lane.b32.xlu0 %v1159_v5, %s999_s7 }
  0xa7   :  { %672 = vrot.lane.b32.xlu1 %v1156_v4, %s999_s7 }
  0xa9   :  { %330 = vrot.lane.b32.xlu0 %v1148_v63, %s999_s7 }
  0xab   :  { %354 = vrot.lane.b32.xlu1 %v1140_v46, %s1000_s13 }
  0xd3   :  { %v489_v8 = vpop.xlane.xlu1 %488 }
  0xd4   :  { %v493_v9 = vmul.f32 0.00390625, %v489_v8  ;;  %v109_v10 = vpop.xlane.xlu0 %108 }
  0xd5   :  { %v114_v13 = vmul.f32 0.00390625, %v109_v10 }
  0xd6   :  { %v495_v14 = vmul.f32 %v493_v9, %v88_v12 }
  0xd7   :  { %v492_v16 = vpop.xlane.xlu1 %491  ;;  %v116_v18 = vmul.f32 %v114_v13, %v88_v12  ;;  %v131_v13 = vshrl.u32 %v130_v11, 7 }
  0xd8   :  { %v494_v19 = vmul.f32 0.00390625, %v492_v16  ;;  %v112_v20 = vpop.xlane.xlu0 %111  ;;  %v497_v22 = vsel %vm118_vm0, %v495_v14, 0.0 }
  0xd9   :  { %v115_v21 = vmul.f32 0.00390625, %v112_v20  ;;  %v119_v28 = vsel %vm118_vm0, %v116_v18, 0.0  ;;  %v1261_v11 = vsub.s32 0, %v131_v13 }
  0xda   :  { %v496_v23 = vmul.f32 %v494_v19, %v89_v17  ;;  %v90_v19 = vld [vmem:[#allocation7] sm:$0x1] }
  0xdb   :  { %v117_v24 = vmul.f32 %v115_v21, %v89_v17  ;;  %v192_v25 = vpop.permute.xlu1 %191 }
  0xdc   :  { %v498_v29 = vsel %vm118_vm0, %v496_v23, 0.0  ;;  %v190_v31 = vpop.permute.xlu0 %189 }
  0xdd   :  { %v499_v32 = vadd.f32 %v498_v29, %v497_v22  ;;  %v120_v33 = vsel %vm118_vm0, %v117_v24, 0.0  ;;  %v196_v34 = vsel %vm195_vm1, %v190_v31, %v192_v25  ;;  %v197_v35 = vsel %vm195_vm1, %v192_v25, %v190_v31 }
  0xde   :  { %v121_v36 = vadd.f32 %v120_v33, %v119_v28  ;;  %v204_v37 = vmul.f32 %v197_v35, %v1222_v26  ;;  %v205_v38 = vmul.f32 %v196_v34, %v1224_v27 }
  0xdf   :  { %v500_v39 = vrot.slane %v499_v32, 4  ;;  %v201_v40 = vpop.permute.xlu1 %200 }
  0xe0   :  { %v122_v43 = vrot.slane %v121_v36, 4  ;;  %v206_v44 = vadd.f32 %v204_v37, %v187_v30  ;;  %v207_v45 = vadd.f32 %v205_v38, %v187_v30  ;;  %v199_v47 = vpop.permute.xlu0 %198 }
  0xe1   :  { %v501_v49 = vadd.f32 %v500_v39, %v499_v32  ;;  %v202_v50 = vsel %vm195_vm1, %v199_v47, %v201_v40  ;;  %v203_v51 = vsel %vm195_vm1, %v201_v40, %v199_v47 }
  0xe2   :  { %v123_v53 = vadd.f32 %v122_v43, %v121_v36  ;;  %v208_v55 = vmul.f32 %v203_v51, %v1238_v41  ;;  %v209_v56 = vmul.f32 %v202_v50, %v1240_v42 }
  0xe3   :  { %v502_v58 = vrot.slane %v501_v49, 2  ;;  %v215_v59 = vpop.permute.xlu1 %214 }
  0xe4   :  { %v124_v60 = vrot.slane %v123_v53, 2  ;;  %v210_v61 = vadd.f32 %v208_v55, %v206_v44  ;;  %v211_v62 = vadd.f32 %v209_v56, %v207_v45  ;;  %v213_v1 = vpop.permute.xlu0 %212  ;;  %v92_v45 = vld [vmem:[%s1527_s5 + $0x8] sm:$0xff] }
  0xe5   :  { %v503_v2 = vadd.f32 %v502_v58, %v501_v49  ;;  %v217_v3 = vsel %vm216_vm2, %v213_v1, %v215_v59  ;;  %v218_v6 = vsel %vm216_vm2, %v215_v59, %v213_v1  ;;  %v237_v58 = vrot.slane %v1238_v41, 1 }
  0xe6   :  { %v125_v8 = vadd.f32 %v124_v60, %v123_v53  ;;  %v231_v9 = vmul.f32 %v227_v48, %v218_v6  ;;  %v232_v10 = vmul.f32 %v228_v52, %v217_v3  ;;  %v238_v59 = vrot.slane %v1240_v42, 1 }
  0xe7   :  { %v567_v12 = vpop.permute.xlu1 %566  ;;  %v504_v14 = vrot.slane %v503_v2, 1 }
  0xe8   :  { %v233_v16 = vadd.f32 %v231_v9, %v210_v61  ;;  %v234_v17 = vadd.f32 %v232_v10, %v211_v62  ;;  %v565_v18 = vpop.permute.xlu0 %564  ;;  %v126_v20 = vrot.slane %v125_v8, 1 }
  0xe9   :  { %v568_v21 = vsel %vm195_vm1, %v565_v18, %v567_v12  ;;  %v569_v22 = vsel %vm195_vm1, %v567_v12, %v565_v18  ;;  %v505_v23 = vadd.f32 %v504_v14, %v503_v2 }
  0xea   :  { %v576_v24 = vmul.f32 %v569_v22, %v1222_v26  ;;  %v577_v25 = vmul.f32 %v568_v21, %v1224_v27  ;;  %v127_v28 = vadd.f32 %v126_v20, %v125_v8 }
  0xeb   :  { %v573_v29 = vpop.permute.xlu1 %572  ;;  %v506_v31 = vadd.f32 %v505_v23, %v90_v19 }
  0xec   :  { %v578_v32 = vadd.f32 %v576_v24, %v187_v30  ;;  %v579_v33 = vadd.f32 %v577_v25, %v187_v30  ;;  %v571_v34 = vpop.permute.xlu0 %570  ;;  %v128_v35 = vadd.f32 %v127_v28, %v90_v19  ;;  %v91_v30 = vld [vmem:[%s1527_s5] sm:$0xff]  ;;  %s1001_s5 = smov 112  }
  0xed   :  { %v574_v36 = vsel %vm195_vm1, %v571_v34, %v573_v29  ;;  %v575_v37 = vsel %vm195_vm1, %v573_v29, %v571_v34  ;;  %v507_v38 = vmax.f32 %v506_v31, 0.0  ;;  %v258_v31 = vrot.slane %v1222_v26, 2 }
  0xee   :  { %v580_v39 = vmul.f32 %v575_v37, %v1238_v41  ;;  %v581_v40 = vmul.f32 %v574_v36, %v1240_v42  ;;  %v129_v43 = vmax.f32 %v128_v35, 0.0 }
  0xef   :  { %v587_v44 = vpop.permute.xlu1 %586  ;;  %v511_v47 = vrot.slane %v507_v38, %v1261_v11 }
  0xf0   :  { %v582_v49 = vadd.f32 %v580_v39, %v578_v32  ;;  %v583_v50 = vadd.f32 %v581_v40, %v579_v33  ;;  %v585_v51 = vpop.permute.xlu0 %584  ;;  %v133_v53 = vrot.slane %v129_v43, %v1261_v11 }
  0xf1   :  { %v588_v55 = vsel %vm216_vm2, %v585_v51, %v587_v44  ;;  %v589_v56 = vsel %vm216_vm2, %v587_v44, %v585_v51  ;;  %v512_v3 = vmul.f32 %v511_v47, %v91_v30  ;;  %v513_v23 = vmul.f32 %v511_v47, %v92_v45 }
  0xf2   :  { %v596_v60 = vmul.f32 %v589_v56, %v227_v48  ;;  %v597_v61 = vmul.f32 %v588_v55, %v228_v52  ;;  %v135_v62 = vmul.f32 %v133_v53, %v92_v45  ;;  %v134_v1 = vmul.f32 %v133_v53, %v91_v30 }
  0xf3   :  { %v222_v2 = vpop.permute.xlu1 %221  ;;  %v514_v22 = vsel %vm118_vm0, %v512_v3, 0.0  ;;  %v517_v35 = vsel %vm118_vm0, %v513_v23, 0.0  ;;  %v266_v51 = vrot.slane %v1238_v41, 2  ;;  %v267_v53 = vrot.slane %v1240_v42, 2 }
  0xf4   :  { %v598_v6 = vadd.f32 %v596_v60, %v582_v49  ;;  %v599_v8 = vadd.f32 %v597_v61, %v583_v50  ;;  %v220_v9 = vpop.permute.xlu0 %219  ;;  %v139_v10 = vsel %vm118_vm0, %v135_v62, 0.0  ;;  %v136_v12 = vsel %vm118_vm0, %v134_v1, 0.0 }
  0xf5   :  { %v223_v13 = vsel %vm216_vm2, %v220_v9, %v222_v2  ;;  %v224_v14 = vsel %vm216_vm2, %v222_v2, %v220_v9  ;;  %140 = vadd.xlane.f32.xlu1 %v139_v10  ;;  %137 = vadd.xlane.f32.xlu0 %v136_v12 }
  0xf6   :  { %v241_v48 = vmul.f32 %v237_v58, %v224_v14  ;;  %v242_v52 = vmul.f32 %v238_v59, %v223_v13  ;;  %v287_v14 = vrot.slane %v1222_v26, 3 }
  0xf7   :  { %v593_v18 = vpop.permute.xlu1 %592 }
  0xf8   :  { %v243_v19 = vadd.f32 %v241_v48, %v233_v16  ;;  %v244_v20 = vadd.f32 %v242_v52, %v234_v17  ;;  %v591_v21 = vpop.permute.xlu0 %590  ;;  %v259_v16 = vrot.slane %v1224_v27, 2  ;;  %v288_v48 = vrot.slane %v1224_v27, 3 }
  0xf9   :  { %v594_v24 = vsel %vm216_vm2, %v591_v21, %v593_v18  ;;  %v595_v25 = vsel %vm216_vm2, %v593_v18, %v591_v21  ;;  %515 = vadd.xlane.f32.xlu1 %v514_v22 }
  0xfa   :  { %v600_v28 = vmul.f32 %v595_v25, %v237_v58  ;;  %v601_v29 = vmul.f32 %v594_v24, %v238_v59 }
  0xfb   :  { %v248_v17 = vpop.permute.xlu1 %247 }
  0xfc   :  { %v602_v32 = vadd.f32 %v600_v28, %v598_v6  ;;  %v603_v33 = vadd.f32 %v601_v29, %v599_v8  ;;  %v246_v34 = vpop.permute.xlu0 %245 }
  0xfd   :  { %v250_v36 = vsel %vm249_vm3, %v246_v34, %v248_v17  ;;  %v251_v37 = vsel %vm249_vm3, %v248_v17, %v246_v34  ;;  %518 = vadd.xlane.f32.xlu1 %v517_v35  ;;  %v303_v34 = vmul.f32 %v1145_v57, %v1222_v26 }
  0xfe   :  { %v262_v38 = vmul.f32 %v258_v31, %v251_v37  ;;  %v263_v39 = vmul.f32 %v259_v16, %v250_v36  ;;  %v304_v37 = vmul.f32 %v1140_v46, %v1224_v27 }
  0xff   :  { %v607_v40 = vpop.permute.xlu1 %606 }
 0x100   :  { %v264_v43 = vadd.f32 %v262_v38, %v243_v19  ;;  %v265_v44 = vadd.f32 %v263_v39, %v244_v20  ;;  %v605_v45 = vpop.permute.xlu0 %604  ;;  %v313_v38 = vmul.f32 %v1148_v63, %v1238_v41 }
 0x101   :  { %v608_v30 = vsel %vm249_vm3, %v605_v45, %v607_v40  ;;  %v609_v47 = vsel %vm249_vm3, %v607_v40, %v605_v45  ;;  %v644_v40 = vmul.f32 %v1159_v5, %v1222_v26 }
 0x102   :  { %v616_v49 = vmul.f32 %v609_v47, %v258_v31  ;;  %v617_v50 = vmul.f32 %v608_v30, %v259_v16  ;;  %v295_v16 = vrot.slane %v1238_v41, 3 }
 0x103   :  { %v255_v55 = vpop.permute.xlu1 %254 }
 0x104   :  { %v618_v56 = vadd.f32 %v616_v49, %v602_v32  ;;  %v619_v58 = vadd.f32 %v617_v50, %v603_v33  ;;  %v253_v59 = vpop.permute.xlu0 %252  ;;  %v296_v33 = vrot.slane %v1240_v42, 3 }
 0x105   :  { %v256_v60 = vsel %vm249_vm3, %v253_v59, %v255_v55  ;;  %v257_v61 = vsel %vm249_vm3, %v255_v55, %v253_v59 }
 0x106   :  { %v270_v62 = vmul.f32 %v266_v51, %v257_v61  ;;  %v271_v1 = vmul.f32 %v267_v53, %v256_v60  ;;  %v648_v60 = vrot.slane %v644_v40, 4 }
 0x107   :  { %v613_v2 = vpop.permute.xlu1 %612 }
 0x108   :  { %v272_v3 = vadd.f32 %v270_v62, %v264_v43  ;;  %v273_v6 = vadd.f32 %v271_v1, %v265_v44  ;;  %v611_v8 = vpop.permute.xlu0 %610  ;;  %v645_v43 = vmul.f32 %v1151_v0, %v1224_v27  ;;  %v314_v44 = vmul.f32 %v1142_v54, %v1240_v42 }
 0x109   :  { %v614_v9 = vsel %vm249_vm3, %v611_v8, %v613_v2  ;;  %v615_v10 = vsel %vm249_vm3, %v613_v2, %v611_v8  ;;  %v655_v8 = vmul.f32 %v1156_v4, %v1240_v42 }
 0x10a   :  { %v620_v12 = vmul.f32 %v615_v10, %v266_v51  ;;  %v621_v13 = vmul.f32 %v614_v9, %v267_v53  ;;  %v307_v51 = vrot.slane %v303_v34, 4  ;;  %v649_v61 = vrot.slane %v645_v43, 4 }
 0x10b   :  { %v277_v52 = vpop.permute.xlu1 %276  ;;  %670 = vrot.lane.b32.xlu0 %v1164_v7, %s999_s7  ;;  %v318_v62 = vrot.slane %v314_v44, 4  ;;  %v345_v44 = vrot.slane %v1240_v42, 5 }
 0x10c   :  { %v622_v18 = vadd.f32 %v620_v12, %v618_v56  ;;  %v623_v19 = vadd.f32 %v621_v13, %v619_v58  ;;  %v275_v20 = vpop.permute.xlu0 %274  ;;  %v308_v56 = vrot.slane %v304_v37, 4  ;;  %v317_v58 = vrot.slane %v313_v38, 4 }
 0x10d   :  { %v279_v21 = vsel %vm278_vm4, %v275_v20, %v277_v52  ;;  %v280_v22 = vsel %vm278_vm4, %v277_v52, %v275_v20  ;;  %v336_v12 = vrot.slane %v1222_v26, 5  ;;  %v337_v13 = vrot.slane %v1224_v27, 5 }
 0x10e   :  { %v291_v23 = vmul.f32 %v287_v14, %v280_v22  ;;  %v292_v24 = vmul.f32 %v288_v48, %v279_v21  ;;  %686 = vrot.lane.b32.xlu1 %v1151_v0, %s1000_s13  ;;  %v344_v38 = vrot.slane %v1238_v41, 5 }
 0x10f   :  { %v627_v25 = vpop.permute.xlu1 %626  ;;  %352 = vrot.lane.b32.xlu0 %v1145_v57, %s1000_s13 }
 0x110   :  { %v293_v28 = vadd.f32 %v291_v23, %v272_v3  ;;  %v294_v29 = vadd.f32 %v292_v24, %v273_v6  ;;  %v625_v31 = vpop.permute.xlu0 %624  ;;  %v654_v6 = vmul.f32 %v1164_v7, %v1238_v41  ;;  %v659_v24 = vrot.slane %v655_v8, 4 }
 0x111   :  { %v628_v17 = vsel %vm278_vm4, %v625_v31, %v627_v25  ;;  %v629_v32 = vsel %vm278_vm4, %v627_v25, %v625_v31 }
 0x112   :  { %v636_v35 = vmul.f32 %v629_v32, %v287_v14  ;;  %v637_v36 = vmul.f32 %v628_v17, %v288_v48  ;;  %361 = vrot.lane.b32.xlu1 %v1142_v54, %s1000_s13  ;;  %v658_v23 = vrot.slane %v654_v6, 4 }
 0x113   :  { %v284_v39 = vpop.permute.xlu1 %283  ;;  %684 = vrot.lane.b32.xlu0 %v1159_v5, %s1000_s13 }
 0x114   :  { %v638_v45 = vadd.f32 %v636_v35, %v622_v18  ;;  %v639_v30 = vadd.f32 %v637_v36, %v623_v19  ;;  %v282_v47 = vpop.permute.xlu0 %281 }
 0x115   :  { %v285_v49 = vsel %vm278_vm4, %v282_v47, %v284_v39  ;;  %v286_v50 = vsel %vm278_vm4, %v284_v39, %v282_v47 }
 0x116   :  { %v299_v53 = vmul.f32 %v295_v16, %v286_v50  ;;  %v300_v55 = vmul.f32 %v296_v33, %v285_v49  ;;  %692 = vrot.lane.b32.xlu1 %v1156_v4, %s1000_s13  ;;  %v1002_v50 = vmov 0  }
 0x117   :  { %v633_v59 = vpop.permute.xlu1 %632  ;;  %359 = vrot.lane.b32.xlu0 %v1148_v63, %s1000_s13  ;;  %843 = vset.pattern.permute.xlu1 %v1002_v50 }
 0x118   :  { %v301_v1 = vadd.f32 %v299_v53, %v293_v28  ;;  %v302_v2 = vadd.f32 %v300_v55, %v294_v29  ;;  %v631_v3 = vpop.permute.xlu0 %630  ;;  %842 = vset.pattern.permute.xlu0 %v1002_v50 }
 0x119   :  { %v634_v9 = vsel %vm278_vm4, %v631_v3, %v633_v59  ;;  %v635_v10 = vsel %vm278_vm4, %v633_v59, %v631_v3 }
 0x11a   :  { %v311_v14 = vadd.f32 %v307_v51, %v301_v1  ;;  %v312_v48 = vadd.f32 %v308_v56, %v302_v2  ;;  %v640_v52 = vmul.f32 %v635_v10, %v295_v16  ;;  %v641_v18 = vmul.f32 %v634_v9, %v296_v33  ;;  %383 = vrot.lane.b32.xlu1 %v1140_v46, %s1001_s5 }
 0x11b   :  { %v326_v19 = vpop.permute.xlu1 %325  ;;  %690 = vrot.lane.b32.xlu0 %v1164_v7, %s1000_s13 }
 0x11c   :  { %v642_v20 = vadd.f32 %v640_v52, %v638_v45  ;;  %v643_v21 = vadd.f32 %v641_v18, %v639_v30  ;;  %v324_v22 = vpop.permute.xlu0 %323  ;;  %v321_v25 = vadd.f32 %v317_v58, %v311_v14  ;;  %v322_v28 = vadd.f32 %v318_v62, %v312_v48 }
 0x11d   :  { %v328_v29 = vsel %vm327_vm5, %v324_v22, %v326_v19  ;;  %v329_v31 = vsel %vm327_vm5, %v326_v19, %v324_v22  ;;  %v366_v48 = vrot.slane %v1224_v27, 6 }
 0x11e   :  { %v652_v16 = vadd.f32 %v648_v60, %v642_v20  ;;  %v653_v17 = vadd.f32 %v649_v61, %v643_v21  ;;  %v340_v32 = vmul.f32 %v336_v12, %v328_v29  ;;  %v341_v33 = vmul.f32 %v337_v13, %v329_v31  ;;  %706 = vrot.lane.b32.xlu1 %v1151_v0, %s1001_s5 }
 0x11f   :  { %v667_v34 = vpop.permute.xlu1 %666  ;;  %381 = vrot.lane.b32.xlu0 %v1145_v57, %s1001_s5 }
 0x120   :  { %v342_v35 = vadd.f32 %v340_v32, %v321_v25  ;;  %v343_v36 = vadd.f32 %v341_v33, %v322_v28  ;;  %v665_v37 = vpop.permute.xlu0 %664  ;;  %v662_v39 = vadd.f32 %v658_v23, %v652_v16  ;;  %v663_v45 = vadd.f32 %v659_v24, %v653_v17 }
 0x121   :  { %v668_v40 = vsel %vm327_vm5, %v665_v37, %v667_v34  ;;  %v669_v43 = vsel %vm327_vm5, %v667_v34, %v665_v37  ;;  %v373_v37 = vrot.slane %v1238_v41, 6 }
 0x122   :  { %v676_v30 = vmul.f32 %v668_v40, %v336_v12  ;;  %v677_v47 = vmul.f32 %v669_v43, %v337_v13  ;;  %390 = vrot.lane.b32.xlu1 %v1142_v54, %s1001_s5 }
 0x123   :  { %v333_v49 = vpop.permute.xlu1 %332  ;;  %704 = vrot.lane.b32.xlu0 %v1159_v5, %s1001_s5 }
 0x124   :  { %v678_v51 = vadd.f32 %v676_v30, %v662_v39  ;;  %v679_v53 = vadd.f32 %v677_v47, %v663_v45  ;;  %v331_v55 = vpop.permute.xlu0 %330 }
 0x125   :  { %v334_v56 = vsel %vm327_vm5, %v331_v55, %v333_v49  ;;  %v335_v58 = vsel %vm327_vm5, %v333_v49, %v331_v55 }
 0x126   :  { %v348_v59 = vmul.f32 %v344_v38, %v334_v56  ;;  %v349_v60 = vmul.f32 %v345_v44, %v335_v58  ;;  %712 = vrot.lane.b32.xlu1 %v1156_v4, %s1001_s5 }
 0x127   :  { %388 = vrot.lane.b32.xlu0 %v1148_v63, %s1001_s5  ;;  %v673_v1 = vpop.permute.xlu1 %672 }
 0x128   :  { %v350_v61 = vadd.f32 %v348_v59, %v342_v35  ;;  %v351_v62 = vadd.f32 %v349_v60, %v343_v36 }
 0x12a   :  { %412 = vrot.lane.b32.xlu1 %v1140_v46, %s1003_s8  ;;  %v94_v46 = vld [vmem:[%s1528_s6 + $0x8] sm:$0xff] }
 0x12b   :  { %710 = vrot.lane.b32.xlu0 %v1164_v7, %s1001_s5  ;;  %v355_v2 = vpop.permute.xlu1 %354  ;;  %s960_s5 = scalar_lea.vmem %s799_s17, 1024 }
 0x12c   :  { %p961_p13 = scmp.ne.s32.totalorder %s799_s17, %s960_s5  ;;  %p966_p1 = scmp.lt.s32.totalorder %s960_s5, %s960_s5 }
 0x12e   :  { %726 = vrot.lane.b32.xlu1 %v1151_v0, %s1003_s8  ;;  %p967_p2 = por %p966_p1, %p965_p0 }
 0x12f   :  { %410 = vrot.lane.b32.xlu0 %v1145_v57, %s1003_s8  ;;  %v93_v57 = vld [vmem:[%s1528_s6] sm:$0xff]  ;;  %s813_s6 = sld [smem:[#allocation3 + $0x2]] }
 0x130   :  { %p968_p3 = pnand %p967_p2, %p961_p13 }
 0x132   :  { %419 = vrot.lane.b32.xlu1 %v1142_v54, %s1003_s8 }
 0x133   :  { %724 = vrot.lane.b32.xlu0 %v1159_v5, %s1003_s8 }
 0x136   :  { %732 = vrot.lane.b32.xlu1 %v1156_v4, %s1003_s8 }
 0x137   :  { %417 = vrot.lane.b32.xlu0 %v1148_v63, %s1003_s8 }
 0x13b   :  { %730 = vrot.lane.b32.xlu0 %v1164_v7, %s1003_s8  ;;  %v365_v7 = vrot.slane %v1222_v26, 6 }
 0x182   :  { %v141_v0 = vpop.xlane.xlu1 %140  ;;  %v138_v54 = vpop.xlane.xlu0 %137 }
 0x183   :  { %v143_v3 = vadd.f32 %v141_v0, %v94_v46  ;;  %v142_v5 = vadd.f32 %v138_v54, %v93_v57  ;;  %v395_v54 = vrot.slane %v1224_v27, 7 }
 0x185   :  { %v816_v6 = vmul.f32 -1.442695, %v143_v3  ;;  %v815_v4 = vmul.f32 -1.442695, %v142_v5 }
 0x186   :  { %v516_v8 = vpop.xlane.xlu1 %515  ;;  %v671_v63 = vpop.permute.xlu0 %670 }
 0x187   :  { %844 = vpow2.f32 %v816_v6  ;;  %v520_v9 = vadd.f32 %v516_v8, %v93_v57  ;;  %v674_v10 = vsel %vm327_vm5, %v671_v63, %v673_v1  ;;  %v675_v12 = vsel %vm327_vm5, %v673_v1, %v671_v63 }
 0x188   :  { %846 = vpow2.f32 %v815_v4  ;;  %v680_v13 = vmul.f32 %v674_v10, %v344_v38  ;;  %v681_v14 = vmul.f32 %v675_v12, %v345_v44  ;;  %v374_v38 = vrot.slane %v1240_v42, 6 }
 0x189   :  { %v823_v52 = vmul.f32 -1.442695, %v520_v9  ;;  %v443_v12 = vstv %s813_s6 }
 0x18a   :  { %v682_v18 = vadd.f32 %v680_v13, %v678_v51  ;;  %v683_v19 = vadd.f32 %v681_v14, %v679_v53  ;;  %v519_v20 = vpop.xlane.xlu1 %518  ;;  %v353_v21 = vpop.permute.xlu0 %352 }
 0x18b   :  { %848 = vpow2.f32 %v823_v52  ;;  %v521_v22 = vadd.f32 %v519_v20, %v94_v46  ;;  %v357_v23 = vsel %vm356_vm6, %v353_v21, %v355_v2  ;;  %v358_v24 = vsel %vm356_vm6, %v355_v2, %v353_v21 }
 0x18c   :  { %v369_v25 = vmul.f32 %v365_v7, %v357_v23  ;;  %v370_v28 = vmul.f32 %v366_v48, %v358_v24  ;;  %v394_v46 = vrot.slane %v1222_v26, 7 }
 0x18d   :  { %v824_v29 = vmul.f32 -1.442695, %v521_v22  ;;  %v402_v22 = vrot.slane %v1238_v41, 7 }
 0x18e   :  { %v371_v31 = vadd.f32 %v369_v25, %v350_v61  ;;  %v372_v16 = vadd.f32 %v370_v28, %v351_v62  ;;  %v687_v17 = vpop.permute.xlu1 %686  ;;  %v685_v32 = vpop.permute.xlu0 %684  ;;  %v403_v28 = vrot.slane %v1240_v42, 7 }
 0x18f   :  { %850 = vpow2.f32 %v824_v29  ;;  %v688_v33 = vsel %vm356_vm6, %v685_v32, %v687_v17  ;;  %v689_v34 = vsel %vm356_vm6, %v687_v17, %v685_v32 }
 0x190   :  { %v696_v35 = vmul.f32 %v688_v33, %v365_v7  ;;  %v697_v36 = vmul.f32 %v689_v34, %v366_v48 }
 0x191   :  { %v845_v39 = vpop.eup %844 }
 0x192   :  { %v847_v40 = vpop.eup %846  ;;  %v151_v43 = vadd.f32 1.0, %v845_v39  ;;  %v698_v44 = vadd.f32 %v696_v35, %v682_v18  ;;  %v699_v45 = vadd.f32 %v697_v36, %v683_v19  ;;  %v362_v30 = vpop.permute.xlu1 %361  ;;  %v446_v18 = vstv %s812_s25 }
 0x193   :  { %v360_v47 = vpop.permute.xlu0 %359  ;;  %v150_v49 = vadd.f32 1.0, %v847_v40 }
 0x194   :  { %v363_v50 = vsel %vm356_vm6, %v360_v47, %v362_v30  ;;  %v364_v51 = vsel %vm356_vm6, %v362_v30, %v360_v47  ;;  %852 = vrcp.f32 %v151_v43 }
 0x195   :  { %v377_v53 = vmul.f32 %v373_v37, %v363_v50  ;;  %v378_v55 = vmul.f32 %v374_v38, %v364_v51  ;;  %v849_v56 = vpop.eup %848  ;;  %854 = vrcp.f32 %v150_v49 }
 0x196   :  { %v528_v58 = vadd.f32 1.0, %v849_v56  ;;  %v693_v61 = vpop.permute.xlu1 %692  ;;  %v98_v56 = vld [vmem:[#allocation8 + $0x18] sm:$0x1] }
 0x197   :  { %v379_v59 = vadd.f32 %v377_v53, %v371_v31  ;;  %v380_v60 = vadd.f32 %v378_v55, %v372_v16  ;;  %v691_v62 = vpop.permute.xlu0 %690  ;;  %v97_v55 = vld [vmem:[#allocation8 + $0x10] sm:$0x1] }
 0x198   :  { %v694_v1 = vsel %vm356_vm6, %v691_v62, %v693_v61  ;;  %v695_v2 = vsel %vm356_vm6, %v693_v61, %v691_v62  ;;  %856 = vrcp.f32 %v528_v58 }
 0x199   :  { %v700_v57 = vmul.f32 %v694_v1, %v373_v37  ;;  %v701_v0 = vmul.f32 %v695_v2, %v374_v38  ;;  %v851_v3 = vpop.eup %850 }
 0x19a   :  { %v529_v5 = vadd.f32 1.0, %v851_v3  ;;  %v384_v8 = vpop.permute.xlu1 %383 }
 0x19b   :  { %v702_v6 = vadd.f32 %v700_v57, %v698_v44  ;;  %v703_v4 = vadd.f32 %v701_v0, %v699_v45  ;;  %v382_v63 = vpop.permute.xlu0 %381 }
 0x19c   :  { %v386_v7 = vsel %vm385_vm7, %v382_v63, %v384_v8  ;;  %v387_v9 = vsel %vm385_vm7, %v384_v8, %v382_v63  ;;  %858 = vrcp.f32 %v529_v5 }
 0x19d   :  { %v398_v10 = vmul.f32 %v394_v46, %v386_v7  ;;  %v399_v26 = vmul.f32 %v395_v54, %v387_v9  ;;  %v101_v7 = vld [vmem:[#allocation10 + $0x10] sm:$0x1]  ;;  %v102_v9 = vld [vmem:[#allocation10 + $0x18] sm:$0x1] }
 0x19e   :  { %v853_v13 = vpop.eup %852  ;;  %v707_v27 = vpop.permute.xlu1 %706 }
 0x19f   :  { %v400_v14 = vadd.f32 %v398_v10, %v379_v59  ;;  %v401_v48 = vadd.f32 %v399_v26, %v380_v60  ;;  %v705_v52 = vpop.permute.xlu0 %704  ;;  %v855_v19 = vpop.eup %854  ;;  %v445_v23 = vmul.f32 %v853_v13, %v443_v12 }
 0x1a0   :  { %v708_v20 = vsel %vm385_vm7, %v705_v52, %v707_v27  ;;  %v709_v21 = vsel %vm385_vm7, %v707_v27, %v705_v52  ;;  %v444_v29 = vmul.f32 %v855_v19, %v443_v12 }
 0x1a1   :  { %v716_v24 = vmul.f32 %v708_v20, %v394_v46  ;;  %v717_v25 = vmul.f32 %v709_v21, %v395_v54  ;;  %v448_v31 = vadd.f32 %v446_v18, %v445_v23 }
 0x1a2   :  { %v857_v16 = vpop.eup %856  ;;  %v391_v33 = vpop.permute.xlu1 %390  ;;  %v447_v35 = vadd.f32 %v446_v18, %v444_v29 }
 0x1a3   :  { %v718_v17 = vadd.f32 %v716_v24, %v702_v6  ;;  %v719_v32 = vadd.f32 %v717_v25, %v703_v4  ;;  %v389_v34 = vpop.permute.xlu0 %388  ;;  %459 = vperm.xlu1 %843, %v448_v31   ;;  %v756_v41 = vmul.f32 %v857_v16, %v443_v12 }
 0x1a4   :  { %v392_v36 = vsel %vm385_vm7, %v389_v34, %v391_v33  ;;  %v393_v37 = vsel %vm385_vm7, %v391_v33, %v389_v34  ;;  %454 = vperm.xlu0 %842, %v447_v35  }
 0x1a5   :  { %v406_v38 = vmul.f32 %v402_v22, %v392_v36  ;;  %v407_v39 = vmul.f32 %v403_v28, %v393_v37  ;;  %v758_v42 = vadd.f32 %v756_v41, %v446_v18 }
 0x1a6   :  { %v859_v40 = vpop.eup %858  ;;  %v713_v45 = vpop.permute.xlu1 %712 }
 0x1a7   :  { %v408_v43 = vadd.f32 %v406_v38, %v400_v14  ;;  %v409_v44 = vadd.f32 %v407_v39, %v401_v48  ;;  %v711_v30 = vpop.permute.xlu0 %710  ;;  %764 = vperm.xlu1 %843, %v758_v42   ;;  %v757_v50 = vmul.f32 %v859_v40, %v443_v12  ;;  %v449_v40 = vstv %s814_s26 }
 0x1a8   :  { %v714_v47 = vsel %vm385_vm7, %v711_v30, %v713_v45  ;;  %v715_v49 = vsel %vm385_vm7, %v713_v45, %v711_v30 }
 0x1a9   :  { %v720_v51 = vmul.f32 %v714_v47, %v402_v22  ;;  %v721_v53 = vmul.f32 %v715_v49, %v403_v28  ;;  %v759_v58 = vadd.f32 %v757_v50, %v446_v18 }
 0x1aa   :  { %v413_v61 = vpop.permute.xlu1 %412 }
 0x1ab   :  { %v722_v59 = vadd.f32 %v720_v51, %v718_v17  ;;  %v723_v60 = vadd.f32 %v721_v53, %v719_v32  ;;  %v411_v62 = vpop.permute.xlu0 %410  ;;  %769 = vperm.xlu0 %842, %v759_v58  }
 0x1ac   :  { %v415_v1 = vsel %vm414_vm8, %v411_v62, %v413_v61  ;;  %v416_v2 = vsel %vm414_vm8, %v413_v61, %v411_v62  ;;  %v876_v61 = vld [vmem:[%s1524_s2 + $0x10] sm:$0xff] }
 0x1ad   :  { %v423_v46 = vmul.f32 %v415_v1, %v97_v55  ;;  %v424_v57 = vmul.f32 %v416_v2, %v98_v56  ;;  %v877_v1 = vld [vmem:[%s1524_s2 + $0x18] sm:$0xff] }
 0x1ae   :  { %v727_v3 = vpop.permute.xlu1 %726 }
 0x1af   :  { %v425_v0 = vadd.f32 %v423_v46, %v408_v43  ;;  %v426_v54 = vadd.f32 %v424_v57, %v409_v44  ;;  %v725_v5 = vpop.permute.xlu0 %724 }
 0x1b0   :  { %v728_v6 = vsel %vm414_vm8, %v725_v5, %v727_v3  ;;  %v729_v4 = vsel %vm414_vm8, %v727_v3, %v725_v5  ;;  %v879_v3 = vld [vmem:[%s1524_s2 + $0x8] sm:$0xff] }
 0x1b1   :  { %v736_v8 = vmul.f32 %v728_v6, %v97_v55  ;;  %v737_v63 = vmul.f32 %v729_v4, %v98_v56 }
 0x1b2   :  { %v420_v12 = vpop.permute.xlu1 %419 }
 0x1b3   :  { %v738_v10 = vadd.f32 %v736_v8, %v722_v59  ;;  %v739_v26 = vadd.f32 %v737_v63, %v723_v60  ;;  %v418_v13 = vpop.permute.xlu0 %417 }
 0x1b4   :  { %v421_v14 = vsel %vm414_vm8, %v418_v13, %v420_v12  ;;  %v422_v48 = vsel %vm414_vm8, %v420_v12, %v418_v13  ;;  %v882_v13 = vld [vmem:[%s1524_s2 + $0x30] sm:$0xff] }
 0x1b5   :  { %v427_v27 = vmul.f32 %v421_v14, %v101_v7  ;;  %v428_v52 = vmul.f32 %v422_v48, %v102_v9  ;;  %v883_v48 = vld [vmem:[%s1524_s2 + $0x38] sm:$0xff] }
 0x1b6   :  { %v733_v20 = vpop.permute.xlu1 %732 }
 0x1b7   :  { %v429_v18 = vadd.f32 %v427_v27, %v425_v0  ;;  %v430_v19 = vadd.f32 %v428_v52, %v426_v54  ;;  %v731_v21 = vpop.permute.xlu0 %730  ;;  %v878_v0 = vld [vmem:[%s1524_s2] sm:$0xff] }
 0x1b8   :  { %v734_v22 = vsel %vm414_vm8, %v731_v21, %v733_v20  ;;  %v735_v23 = vsel %vm414_vm8, %v733_v20, %v731_v21 }
 0x1b9   :  { %v740_v24 = vmul.f32 %v734_v22, %v101_v7  ;;  %v741_v25 = vmul.f32 %v735_v23, %v102_v9  ;;  %v817_v31 = vmul.f32 -1.442695, %v429_v18  ;;  %v818_v16 = vmul.f32 -1.442695, %v430_v19  ;;  %v881_v7 = vld [vmem:[%s1524_s2 + $0x28] sm:$0xff] }
 0x1bb   :  { %v742_v28 = vadd.f32 %v740_v24, %v738_v10  ;;  %v743_v29 = vadd.f32 %v741_v25, %v739_v26  ;;  %860 = vpow2.f32 %v817_v31 }
 0x1bc   :  { %862 = vpow2.f32 %v818_v16 }
 0x1bd   :  { %v825_v17 = vmul.f32 -1.442695, %v742_v28  ;;  %v826_v32 = vmul.f32 -1.442695, %v743_v29 }
 0x1bf   :  { %864 = vpow2.f32 %v825_v17 }
 0x1c0   :  { %866 = vpow2.f32 %v826_v32 }
 0x1c5   :  { %v861_v33 = vpop.eup %860 }
 0x1c6   :  { %v863_v34 = vpop.eup %862  ;;  %v437_v35 = vadd.f32 1.0, %v861_v33 }
 0x1c7   :  { %v438_v37 = vadd.f32 1.0, %v863_v34 }
 0x1c8   :  { %868 = vrcp.f32 %v437_v35 }
 0x1c9   :  { %v865_v36 = vpop.eup %864  ;;  %870 = vrcp.f32 %v438_v37 }
 0x1ca   :  { %v867_v41 = vpop.eup %866  ;;  %v750_v15 = vadd.f32 1.0, %v865_v36 }
 0x1cb   :  { %v751_v38 = vadd.f32 1.0, %v867_v41 }
 0x1cc   :  { %872 = vrcp.f32 %v750_v15 }
 0x1cd   :  { %874 = vrcp.f32 %v751_v38 }
 0x1d2   :  { %v869_v39 = vpop.eup %868 }
 0x1d3   :  { %v871_v42 = vpop.eup %870  ;;  %v450_v44 = vmul.f32 %v869_v39, %v449_v40 }
 0x1d4   :  { %v451_v45 = vmul.f32 %v871_v42, %v449_v40 }
 0x1d5   :  { %v465_v47 = vrot.slane %v450_v44, %v1261_v11 }
 0x1d6   :  { %v873_v43 = vpop.eup %872  ;;  %v469_v49 = vrot.slane %v451_v45, %v1261_v11 }
 0x1d7   :  { %v875_v30 = vpop.eup %874  ;;  %v760_v50 = vmul.f32 %v873_v43, %v449_v40 }
 0x1d8   :  { %v761_v51 = vmul.f32 %v875_v30, %v449_v40 }
 0x1d9   :  { %v775_v46 = vrot.slane %v760_v50, %v1261_v11 }
 0x1da   :  { %v779_v57 = vrot.slane %v761_v51, %v1261_v11  ;;  %v880_v11 = vld [vmem:[%s1524_s2 + $0x20] sm:$0xff] }
 0x222   :  { %v460_v53 = vpop.permute.xlu1 %459 }
 0x223   :  { %v472_v55 = vadd.f32 %v465_v47, %v460_v53  ;;  %v473_v56 = vadd.f32 %v469_v49, %v460_v53  ;;  %v455_v58 = vpop.permute.xlu0 %454 }
 0x224   :  { %v470_v59 = vadd.f32 %v465_v47, %v455_v58  ;;  %v471_v60 = vadd.f32 %v469_v49, %v455_v58 }
 0x225   :  { %v476_v62 = vmul.f32 %v876_v61, %v472_v55  ;;  %v477_v2 = vmul.f32 %v877_v1, %v473_v56 }
 0x226   :  { %v474_v54 = vmul.f32 %v878_v0, %v470_v59  ;;  %v475_v5 = vmul.f32 %v879_v3, %v471_v60  ;;  %v765_v6 = vpop.permute.xlu1 %764 }
 0x227   :  { %480 = vst [vmem:[#allocation11 + $0x10] sm:$0xff] %v476_v62  ;;  %481 = vst [vmem:[#allocation11 + $0x18] sm:$0xff] %v477_v2  ;;  %v780_v4 = vadd.f32 %v775_v46, %v765_v6  ;;  %v781_v8 = vadd.f32 %v779_v57, %v765_v6 }
 0x228   :  { %478 = vst [vmem:[#allocation11] sm:$0xff] %v474_v54  ;;  %479 = vst [vmem:[#allocation11 + $0x8] sm:$0xff] %v475_v5 }
 0x229   :  { %v784_v63 = vmul.f32 %v880_v11, %v780_v4  ;;  %v785_v9 = vmul.f32 %v881_v7, %v781_v8 }
 0x22a   :  { %v770_v10 = vpop.permute.xlu0 %769 }
 0x22b   :  { %789 = vst [vmem:[#allocation11 + $0x20] sm:$0xff] %v784_v63  ;;  %790 = vst [vmem:[#allocation11 + $0x28] sm:$0xff] %v785_v9  ;;  %v782_v26 = vadd.f32 %v775_v46, %v770_v10  ;;  %v783_v12 = vadd.f32 %v779_v57, %v770_v10 }
 0x22d   :  { %v786_v14 = vmul.f32 %v882_v13, %v782_v26  ;;  %v787_v27 = vmul.f32 %v883_v48, %v783_v12 }
 0x22f   :  { %791 = vst [vmem:[#allocation11 + $0x30] sm:$0xff] %v786_v14  ;;  %792 = vst [vmem:[#allocation11 + $0x38] sm:$0xff] %v787_v27 }
 0x230   :  { %971 = shalt.err (!%p968_p3)
}
 0x231   :  { %s972_s23 = scalar_lea.hbm %s1531_s9, 1024 }
 0x232   :  { %p973_p4 = scmp.ne.s32.totalorder %s1531_s9, %s972_s23  ;;  %p976_p5 = scmp.lt.u32.totalorder %s972_s23, %s1531_s9 }
 0x234   :  { %p978_p6 = pnand %p976_p5, %p973_p4 }
 0x236   :  { %981 = shalt.err (!%p978_p6)
}
 0x237   :  { %804 = dma.vmem_to_hbm [thread:$0]  %s799_s17, 1024, %s1531_s9, [#allocation5], %s991_s19, %s991_s19, %s992_s20  }
 0x238   :  { %988 = dma.done.wait [#allocation5], 1024  }
 0x239   :  { %989 = vsyncadd [#allocation5], 4294966272 }
 0x23a   :  { %808 = vsyncpa [#allocation4], 1 }
 0x23b   :  { %809 = vsyncpa [#allocation9], 1 }
 0x23c   :  { %810 = vsyncpa [#allocation5], 1 }
 0x23d   :  { %811 = vsyncpa [#allocation6], 1 }

</bundles_post_ra>
